<compile_context>
chip_gen: v7x
topology: tpu7x:2x2x1
jax: 0.10.0
libtpu: 0.0.40
codegen_flags: <defaults>
</compile_context>

<pallas_src>
import numpy as np
import jax
import jax.numpy as jnp
from jax.experimental import pallas as pl
from jax.experimental.pallas import tpu as pltpu


def _paiconv_kernel(xn_ref, fn_ref, ker_ref, pad_ref, w_ref, b_ref, out_ref):
    # xn_ref : (3, k, TM)       neighbour xyz, TM points on the lane axis
    # fn_ref : (C, k, TM)       neighbour features
    # ker_ref: (3, NK, 1)       soft-assignment kernels (column per coordinate)
    # pad_ref: (k, NK, 1)       one_padding rows
    # w_ref  : (out_c, 2C)      group-shuffle-folded 1x1 conv weight
    # b_ref  : (out_c, 1)       conv bias
    # out_ref: (out_c, TM)
    k = xn_ref.shape[1]
    nk = ker_ref.shape[1]
    C = fn_ref.shape[0]
    out_c, tm = out_ref.shape

    # Hoisted lane-broadcasts of the kernel columns (JAX does not CSE
    # broadcast_in_dim, so do it once, not per (c, j)).
    kcol = [jnp.broadcast_to(ker_ref[c], (nk, tm)) for c in range(3)]
    xc = [xn_ref[c, 0:1, :] for c in range(3)]            # centre xyz, (1, TM)

    # permatrix = x_relative @ kernels + one_padding, built as one (NK, TM)
    # slab per neighbour j.  k is unrolled in Python so every op is a
    # full-lane VPU op and all k-reductions below are elementwise slab ops.
    perm = []
    for j in range(k):
        s = jnp.broadcast_to(pad_ref[j], (nk, tm))
        if j > 0:                                          # x_relative[:,0] == 0 exactly
            for c in range(3):
                xr = jnp.broadcast_to(xn_ref[c, j:j + 1, :] - xc[c], (nk, tm))
                s = s + kcol[c] * xr
        perm.append(s)

    # TODO(synk): topkmax() is not defined in the provided snippet; using the
    # PaiConv-style sparsification: relu, then zero entries below 10% of the
    # per-kernel-column max over the k neighbours.
    perm = [jnp.maximum(p, 0.0) for p in perm]
    pmax = perm[0]
    for j in range(1, k):
        pmax = jnp.maximum(pmax, perm[j])
    thr = 0.1 * pmax
    perm = [jnp.where(p > thr, p, 0.0) for p in perm]

    psum = perm[0]
    for j in range(1, k):
        psum = psum + perm[j]
    inv = pl.reciprocal(psum + 1e-6, approx=True)          # EUP, off the VALU slots
    colsum = psum * inv                                    # = sum_j pn[j]  (exact)

    # t[c] = sum_j f_relative[c, j] * pn[j]   -> (NK, TM) per channel.
    f0 = [fn_ref[c, 0:1, :] for c in range(C)]             # centre features, (1, TM)
    t = [None] * C
    for j in range(1, k):                                  # f_relative[:, 0] == 0 exactly
        pn_j = perm[j] * inv
        for c in range(C):
            fr = jnp.broadcast_to(fn_ref[c, j:j + 1, :] - f0[c], (nk, tm))
            term = fr * pn_j
            t[c] = term if t[c] is None else t[c] + term
    t = [acc if acc is not None else jnp.zeros((nk, tm), jnp.float32) for acc in t]

    # y[o, n] = (W1 @ f0)[o] * colsum[n] + sum_c W2[o, c] * t[c][n] + b[o]
    # which equals conv1x1(cat([f_repeat, f_relative]) @ pn); then max over n.
    for o in range(out_c):
        a0 = w_ref[o:o + 1, 0:1] * f0[0]
        for c in range(1, C):
            a0 = a0 + w_ref[o:o + 1, c:c + 1] * f0[c]      # (1, TM)
        y = jnp.broadcast_to(a0, (nk, tm)) * colsum
        for c in range(C):
            y = y + w_ref[o:o + 1, C + c:C + c + 1] * t[c]
        out_ref[o:o + 1, :] = (jnp.max(y, axis=0, keepdims=True)
                               + b_ref[o:o + 1, :])


def _pick_tm(M, tm_max):
    # Largest multiple of 128 that divides M, capped at tm_max; prefer a grid
    # of >= 2 steps so v7x's two TensorCores both get work.  Fallback tm = M
    # (block == full array) is always layout-legal.
    cands = [t for t in range(128, min(tm_max, M) + 1, 128) if M % t == 0]
    if not cands:
        return M
    pref = [t for t in cands if M // t >= 2]
    return max(pref) if pref else max(cands)


def paiconv_dg_forward(x, feature, neigh_indexs, params, *, k, num_kernel,
                       dilation=1, group=4, tm_max=1024):
    """x: (B, 3, N); feature: (B, in_c, N); neigh_indexs: (B, N, >=k*dilation)."""
    B, C, N = feature.shape
    out_c = params['conv_b'].shape[0]
    M = B * N
    tm = _pick_tm(M, tm_max)

    # ---- glue: dilated neighbour selection + gather, produced directly in the
    # lane-dense (coord/channel, k, M) layout (no post-gather transpose of the
    # big gathered tensors).
    neigh = neigh_indexs[:, :, : k * dilation: dilation]             # (B, N, k)
    idx_base = (jnp.arange(B, dtype=neigh.dtype) * N)[:, None, None]
    idx_km = (neigh + idx_base).reshape(M, k).T                      # (k, M)

    x_cm = jnp.transpose(x, (1, 0, 2)).reshape(3, M)                 # (3, M)
    f_cm = jnp.transpose(feature, (1, 0, 2)).reshape(C, M)           # (C, M)
    xn = jnp.take(x_cm, idx_km, axis=1)                              # (3, k, M)
    fn = jnp.take(f_cm, idx_km, axis=1)                              # (C, k, M)
    # TODO(synk): the k-times gathered neighbour tensors still round-trip
    # through HBM; an in-kernel gather (scalar-prefetched indices + per-tile
    # DMA) would remove that traffic entirely.

    # ---- glue: fold the group channel-shuffle into the 1x1 conv weight ----
    W = params['conv_w']                                             # (out_c, 2C)
    if 2 * C > 2 * 3:
        d = (2 * C) // group
        q = np.arange(2 * C).reshape(group, d).T.reshape(-1)         # new->orig channel
        W_eff = jnp.zeros_like(W).at[:, q].set(W)                    # W@shuffle == W_eff@cat
    else:
        W_eff = W

    kerT = params['kernels'].reshape(3, num_kernel, 1)
    padT = params['one_padding'].reshape(k, num_kernel, 1)
    bias = params['conv_b'].reshape(out_c, 1)

    # ---- Pallas kernel: per-point hot path, output lane-dense as (out_c, M).
    # Tiny constant operands use a constant index_map so the pipeline does not
    # re-fetch them between grid steps.
    out_cm = pl.pallas_call(
        _paiconv_kernel,
        out_shape=jax.ShapeDtypeStruct((out_c, M), jnp.float32),
        grid_spec=pltpu.PrefetchScalarGridSpec(
            num_scalar_prefetch=0,
            grid=(M // tm,),
            in_specs=[
                pl.BlockSpec((3, k, tm), lambda i: (0, 0, i)),
                pl.BlockSpec((C, k, tm), lambda i: (0, 0, i)),
                pl.BlockSpec((3, num_kernel, 1), lambda i: (0, 0, 0)),
                pl.BlockSpec((k, num_kernel, 1), lambda i: (0, 0, 0)),
                pl.BlockSpec((out_c, 2 * C), lambda i: (0, 0)),
                pl.BlockSpec((out_c, 1), lambda i: (0, 0)),
            ],
            out_specs=pl.BlockSpec((out_c, tm), lambda i: (0, i)),
        ),
        compiler_params=pltpu.CompilerParams(
            dimension_semantics=("parallel",),
            vmem_limit_bytes=32 * 1024 * 1024),
    )(xn, fn, kerT, padT, W_eff.astype(jnp.float32), bias.astype(jnp.float32))

    # ---- glue: BatchNorm1d (training-mode batch stats) + residual ----
    out = out_cm.reshape(out_c, B, N)
    mean = out.mean(axis=(1, 2), keepdims=True)
    var = ((out - mean) ** 2).mean(axis=(1, 2), keepdims=True)       # biased, as torch BN
    out = (out - mean) * jax.lax.rsqrt(var + 1e-5)
    out = out * params['bn_w'][:, None, None] + params['bn_b'][:, None, None]
    out = jnp.transpose(out, (1, 0, 2))                              # (B, out_c, N)
    if C == out_c:
        out = out + feature
    return out


if __name__ == "__main__":
    B, N = 2, 128
    in_c, out_c = 4, 4
    k, num_kernel, dilation = 8, 8, 2

    key = jax.random.PRNGKey(0)
    k1, k2, k3, k4, k5, k6 = jax.random.split(key, 6)

    x = jax.random.normal(k1, (B, 3, N), jnp.float32)
    feature = jax.random.normal(k2, (B, in_c, N), jnp.float32)
    neigh_indexs = jax.random.randint(k3, (B, N, k * dilation), 0, N,
                                      dtype=jnp.int32)
    # neighbour 0 is the point itself (usual kNN convention; centre of x_relative)
    neigh_indexs = neigh_indexs.at[:, :, 0].set(
        jnp.broadcast_to(jnp.arange(N, dtype=jnp.int32)[None, :], (B, N)))

    params = dict(
        kernels=jax.random.normal(k4, (3, num_kernel), jnp.float32),
        one_padding=jnp.zeros((k, num_kernel), jnp.float32).at[0, 0].set(1.0),
        conv_w=0.2 * jax.random.normal(k5, (out_c, 2 * in_c), jnp.float32),
        conv_b=0.1 * jax.random.normal(k6, (out_c,), jnp.float32),
        bn_w=jnp.ones((out_c,), jnp.float32),
        bn_b=jnp.zeros((out_c,), jnp.float32),
    )

    out = paiconv_dg_forward(x, feature, neigh_indexs, params,
                             k=k, num_kernel=num_kernel, dilation=dilation)
    jax.block_until_ready(out)
    assert out.shape == (B, out_c, N)
    print("KERNEL_OK")
</pallas_src>

<mosaic_0001>
module attributes {stable_mosaic.version = 11 : i64} {
  func.func @_paiconv_kernel(%arg0: i32, %arg1: memref<3x8x128xf32, #tpu.memory_space<vmem>>, %arg2: memref<4x8x128xf32, #tpu.memory_space<vmem>>, %arg3: memref<3x8x1xf32, #tpu.memory_space<vmem>>, %arg4: memref<8x8x1xf32, #tpu.memory_space<vmem>>, %arg5: memref<4x8xf32, #tpu.memory_space<vmem>>, %arg6: memref<4x1xf32, #tpu.memory_space<vmem>>, %arg7: memref<4x128xf32, #tpu.memory_space<vmem>>) attributes {dimension_semantics = [#tpu.dimension_semantics<parallel>], iteration_bounds = array<i64: 2>, scalar_prefetch = 0 : i64, scratch_operands = 0 : i64, tpu.core_type = #tpu.core_type<tc>, window_params = [{transform_indices = @transform_0, window_bounds = array<i64: 3, 8, 128>}, {transform_indices = @transform_1, window_bounds = array<i64: 4, 8, 128>}, {pipeline_mode = #tpu.pipeline_mode<synchronous>, transform_indices = @transform_2, window_bounds = array<i64: 3, 8, 1>}, {pipeline_mode = #tpu.pipeline_mode<synchronous>, transform_indices = @transform_3, window_bounds = array<i64: 8, 8, 1>}, {pipeline_mode = #tpu.pipeline_mode<synchronous>, transform_indices = @transform_4, window_bounds = array<i64: 4, 8>}, {pipeline_mode = #tpu.pipeline_mode<synchronous>, transform_indices = @transform_5, window_bounds = array<i64: 4, 1>}, {transform_indices = @transform_6, window_bounds = array<i64: 4, 128>}]} {
    %c0 = arith.constant 0 : index
    %c0_0 = arith.constant 0 : index
    %c0_1 = arith.constant 0 : index
    %0 = vector.load %arg3[%c0, %c0_0, %c0_1] : memref<3x8x1xf32, #tpu.memory_space<vmem>>, vector<1x8x1xf32>
    %1 = vector.shape_cast %0 : vector<1x8x1xf32> to vector<8x1xf32>
    %2 = vector.shape_cast %1 : vector<8x1xf32> to vector<8x1xf32>
    %3 = vector.broadcast %2 : vector<8x1xf32> to vector<8x128xf32>
    %c1 = arith.constant 1 : index
    %c0_2 = arith.constant 0 : index
    %c0_3 = arith.constant 0 : index
    %4 = vector.load %arg3[%c1, %c0_2, %c0_3] : memref<3x8x1xf32, #tpu.memory_space<vmem>>, vector<1x8x1xf32>
    %5 = vector.shape_cast %4 : vector<1x8x1xf32> to vector<8x1xf32>
    %6 = vector.shape_cast %5 : vector<8x1xf32> to vector<8x1xf32>
    %7 = vector.broadcast %6 : vector<8x1xf32> to vector<8x128xf32>
    %c2 = arith.constant 2 : index
    %c0_4 = arith.constant 0 : index
    %c0_5 = arith.constant 0 : index
    %8 = vector.load %arg3[%c2, %c0_4, %c0_5] : memref<3x8x1xf32, #tpu.memory_space<vmem>>, vector<1x8x1xf32>
    %9 = vector.shape_cast %8 : vector<1x8x1xf32> to vector<8x1xf32>
    %10 = vector.shape_cast %9 : vector<8x1xf32> to vector<8x1xf32>
    %11 = vector.broadcast %10 : vector<8x1xf32> to vector<8x128xf32>
    %c0_6 = arith.constant 0 : index
    %c0_7 = arith.constant 0 : index
    %c0_8 = arith.constant 0 : index
    %12 = vector.load %arg1[%c0_6, %c0_7, %c0_8] : memref<3x8x128xf32, #tpu.memory_space<vmem>>, vector<1x1x128xf32>
    %13 = vector.shape_cast %12 : vector<1x1x128xf32> to vector<1x128xf32>
    %c1_9 = arith.constant 1 : index
    %c0_10 = arith.constant 0 : index
    %c0_11 = arith.constant 0 : index
    %14 = vector.load %arg1[%c1_9, %c0_10, %c0_11] : memref<3x8x128xf32, #tpu.memory_space<vmem>>, vector<1x1x128xf32>
    %15 = vector.shape_cast %14 : vector<1x1x128xf32> to vector<1x128xf32>
    %c2_12 = arith.constant 2 : index
    %c0_13 = arith.constant 0 : index
    %c0_14 = arith.constant 0 : index
    %16 = vector.load %arg1[%c2_12, %c0_13, %c0_14] : memref<3x8x128xf32, #tpu.memory_space<vmem>>, vector<1x1x128xf32>
    %17 = vector.shape_cast %16 : vector<1x1x128xf32> to vector<1x128xf32>
    %c0_15 = arith.constant 0 : index
    %c0_16 = arith.constant 0 : index
    %c0_17 = arith.constant 0 : index
    %18 = vector.load %arg4[%c0_15, %c0_16, %c0_17] : memref<8x8x1xf32, #tpu.memory_space<vmem>>, vector<1x8x1xf32>
    %19 = vector.shape_cast %18 : vector<1x8x1xf32> to vector<8x1xf32>
    %20 = vector.shape_cast %19 : vector<8x1xf32> to vector<8x1xf32>
    %21 = vector.broadcast %20 : vector<8x1xf32> to vector<8x128xf32>
    %c1_18 = arith.constant 1 : index
    %c0_19 = arith.constant 0 : index
    %c0_20 = arith.constant 0 : index
    %22 = vector.load %arg4[%c1_18, %c0_19, %c0_20] : memref<8x8x1xf32, #tpu.memory_space<vmem>>, vector<1x8x1xf32>
    %23 = vector.shape_cast %22 : vector<1x8x1xf32> to vector<8x1xf32>
    %24 = vector.shape_cast %23 : vector<8x1xf32> to vector<8x1xf32>
    %25 = vector.broadcast %24 : vector<8x1xf32> to vector<8x128xf32>
    %c0_21 = arith.constant 0 : index
    %c1_22 = arith.constant 1 : index
    %c0_23 = arith.constant 0 : index
    %26 = vector.load %arg1[%c0_21, %c1_22, %c0_23] : memref<3x8x128xf32, #tpu.memory_space<vmem>>, vector<1x1x128xf32>
    %27 = vector.shape_cast %26 : vector<1x1x128xf32> to vector<1x128xf32>
    %28 = arith.subf %27, %13 : vector<1x128xf32>
    %29 = vector.shape_cast %28 : vector<1x128xf32> to vector<1x128xf32>
    %30 = vector.broadcast %29 : vector<1x128xf32> to vector<8x128xf32>
    %31 = arith.mulf %3, %30 : vector<8x128xf32>
    %32 = arith.addf %25, %31 : vector<8x128xf32>
    %c1_24 = arith.constant 1 : index
    %c1_25 = arith.constant 1 : index
    %c0_26 = arith.constant 0 : index
    %33 = vector.load %arg1[%c1_24, %c1_25, %c0_26] : memref<3x8x128xf32, #tpu.memory_space<vmem>>, vector<1x1x128xf32>
    %34 = vector.shape_cast %33 : vector<1x1x128xf32> to vector<1x128xf32>
    %35 = arith.subf %34, %15 : vector<1x128xf32>
    %36 = vector.shape_cast %35 : vector<1x128xf32> to vector<1x128xf32>
    %37 = vector.broadcast %36 : vector<1x128xf32> to vector<8x128xf32>
    %38 = arith.mulf %7, %37 : vector<8x128xf32>
    %39 = arith.addf %32, %38 : vector<8x128xf32>
    %c2_27 = arith.constant 2 : index
    %c1_28 = arith.constant 1 : index
    %c0_29 = arith.constant 0 : index
    %40 = vector.load %arg1[%c2_27, %c1_28, %c0_29] : memref<3x8x128xf32, #tpu.memory_space<vmem>>, vector<1x1x128xf32>
    %41 = vector.shape_cast %40 : vector<1x1x128xf32> to vector<1x128xf32>
    %42 = arith.subf %41, %17 : vector<1x128xf32>
    %43 = vector.shape_cast %42 : vector<1x128xf32> to vector<1x128xf32>
    %44 = vector.broadcast %43 : vector<1x128xf32> to vector<8x128xf32>
    %45 = arith.mulf %11, %44 : vector<8x128xf32>
    %46 = arith.addf %39, %45 : vector<8x128xf32>
    %c2_30 = arith.constant 2 : index
    %c0_31 = arith.constant 0 : index
    %c0_32 = arith.constant 0 : index
    %47 = vector.load %arg4[%c2_30, %c0_31, %c0_32] : memref<8x8x1xf32, #tpu.memory_space<vmem>>, vector<1x8x1xf32>
    %48 = vector.shape_cast %47 : vector<1x8x1xf32> to vector<8x1xf32>
    %49 = vector.shape_cast %48 : vector<8x1xf32> to vector<8x1xf32>
    %50 = vector.broadcast %49 : vector<8x1xf32> to vector<8x128xf32>
    %c0_33 = arith.constant 0 : index
    %c2_34 = arith.constant 2 : index
    %c0_35 = arith.constant 0 : index
    %51 = vector.load %arg1[%c0_33, %c2_34, %c0_35] : memref<3x8x128xf32, #tpu.memory_space<vmem>>, vector<1x1x128xf32>
    %52 = vector.shape_cast %51 : vector<1x1x128xf32> to vector<1x128xf32>
    %53 = arith.subf %52, %13 : vector<1x128xf32>
    %54 = vector.shape_cast %53 : vector<1x128xf32> to vector<1x128xf32>
    %55 = vector.broadcast %54 : vector<1x128xf32> to vector<8x128xf32>
    %56 = arith.mulf %3, %55 : vector<8x128xf32>
    %57 = arith.addf %50, %56 : vector<8x128xf32>
    %c1_36 = arith.constant 1 : index
    %c2_37 = arith.constant 2 : index
    %c0_38 = arith.constant 0 : index
    %58 = vector.load %arg1[%c1_36, %c2_37, %c0_38] : memref<3x8x128xf32, #tpu.memory_space<vmem>>, vector<1x1x128xf32>
    %59 = vector.shape_cast %58 : vector<1x1x128xf32> to vector<1x128xf32>
    %60 = arith.subf %59, %15 : vector<1x128xf32>
    %61 = vector.shape_cast %60 : vector<1x128xf32> to vector<1x128xf32>
    %62 = vector.broadcast %61 : vector<1x128xf32> to vector<8x128xf32>
    %63 = arith.mulf %7, %62 : vector<8x128xf32>
    %64 = arith.addf %57, %63 : vector<8x128xf32>
    %c2_39 = arith.constant 2 : index
    %c2_40 = arith.constant 2 : index
    %c0_41 = arith.constant 0 : index
    %65 = vector.load %arg1[%c2_39, %c2_40, %c0_41] : memref<3x8x128xf32, #tpu.memory_space<vmem>>, vector<1x1x128xf32>
    %66 = vector.shape_cast %65 : vector<1x1x128xf32> to vector<1x128xf32>
    %67 = arith.subf %66, %17 : vector<1x128xf32>
    %68 = vector.shape_cast %67 : vector<1x128xf32> to vector<1x128xf32>
    %69 = vector.broadcast %68 : vector<1x128xf32> to vector<8x128xf32>
    %70 = arith.mulf %11, %69 : vector<8x128xf32>
    %71 = arith.addf %64, %70 : vector<8x128xf32>
    %c3 = arith.constant 3 : index
    %c0_42 = arith.constant 0 : index
    %c0_43 = arith.constant 0 : index
    %72 = vector.load %arg4[%c3, %c0_42, %c0_43] : memref<8x8x1xf32, #tpu.memory_space<vmem>>, vector<1x8x1xf32>
    %73 = vector.shape_cast %72 : vector<1x8x1xf32> to vector<8x1xf32>
    %74 = vector.shape_cast %73 : vector<8x1xf32> to vector<8x1xf32>
    %75 = vector.broadcast %74 : vector<8x1xf32> to vector<8x128xf32>
    %c0_44 = arith.constant 0 : index
    %c3_45 = arith.constant 3 : index
    %c0_46 = arith.constant 0 : index
    %76 = vector.load %arg1[%c0_44, %c3_45, %c0_46] : memref<3x8x128xf32, #tpu.memory_space<vmem>>, vector<1x1x128xf32>
    %77 = vector.shape_cast %76 : vector<1x1x128xf32> to vector<1x128xf32>
    %78 = arith.subf %77, %13 : vector<1x128xf32>
    %79 = vector.shape_cast %78 : vector<1x128xf32> to vector<1x128xf32>
    %80 = vector.broadcast %79 : vector<1x128xf32> to vector<8x128xf32>
    %81 = arith.mulf %3, %80 : vector<8x128xf32>
    %82 = arith.addf %75, %81 : vector<8x128xf32>
    %c1_47 = arith.constant 1 : index
    %c3_48 = arith.constant 3 : index
    %c0_49 = arith.constant 0 : index
    %83 = vector.load %arg1[%c1_47, %c3_48, %c0_49] : memref<3x8x128xf32, #tpu.memory_space<vmem>>, vector<1x1x128xf32>
    %84 = vector.shape_cast %83 : vector<1x1x128xf32> to vector<1x128xf32>
    %85 = arith.subf %84, %15 : vector<1x128xf32>
    %86 = vector.shape_cast %85 : vector<1x128xf32> to vector<1x128xf32>
    %87 = vector.broadcast %86 : vector<1x128xf32> to vector<8x128xf32>
    %88 = arith.mulf %7, %87 : vector<8x128xf32>
    %89 = arith.addf %82, %88 : vector<8x128xf32>
    %c2_50 = arith.constant 2 : index
    %c3_51 = arith.constant 3 : index
    %c0_52 = arith.constant 0 : index
    %90 = vector.load %arg1[%c2_50, %c3_51, %c0_52] : memref<3x8x128xf32, #tpu.memory_space<vmem>>, vector<1x1x128xf32>
    %91 = vector.shape_cast %90 : vector<1x1x128xf32> to vector<1x128xf32>
    %92 = arith.subf %91, %17 : vector<1x128xf32>
    %93 = vector.shape_cast %92 : vector<1x128xf32> to vector<1x128xf32>
    %94 = vector.broadcast %93 : vector<1x128xf32> to vector<8x128xf32>
    %95 = arith.mulf %11, %94 : vector<8x128xf32>
    %96 = arith.addf %89, %95 : vector<8x128xf32>
    %c4 = arith.constant 4 : index
    %c0_53 = arith.constant 0 : index
    %c0_54 = arith.constant 0 : index
    %97 = vector.load %arg4[%c4, %c0_53, %c0_54] : memref<8x8x1xf32, #tpu.memory_space<vmem>>, vector<1x8x1xf32>
    %98 = vector.shape_cast %97 : vector<1x8x1xf32> to vector<8x1xf32>
    %99 = vector.shape_cast %98 : vector<8x1xf32> to vector<8x1xf32>
    %100 = vector.broadcast %99 : vector<8x1xf32> to vector<8x128xf32>
    %c0_55 = arith.constant 0 : index
    %c4_56 = arith.constant 4 : index
    %c0_57 = arith.constant 0 : index
    %101 = vector.load %arg1[%c0_55, %c4_56, %c0_57] : memref<3x8x128xf32, #tpu.memory_space<vmem>>, vector<1x1x128xf32>
    %102 = vector.shape_cast %101 : vector<1x1x128xf32> to vector<1x128xf32>
    %103 = arith.subf %102, %13 : vector<1x128xf32>
    %104 = vector.shape_cast %103 : vector<1x128xf32> to vector<1x128xf32>
    %105 = vector.broadcast %104 : vector<1x128xf32> to vector<8x128xf32>
    %106 = arith.mulf %3, %105 : vector<8x128xf32>
    %107 = arith.addf %100, %106 : vector<8x128xf32>
    %c1_58 = arith.constant 1 : index
    %c4_59 = arith.constant 4 : index
    %c0_60 = arith.constant 0 : index
    %108 = vector.load %arg1[%c1_58, %c4_59, %c0_60] : memref<3x8x128xf32, #tpu.memory_space<vmem>>, vector<1x1x128xf32>
    %109 = vector.shape_cast %108 : vector<1x1x128xf32> to vector<1x128xf32>
    %110 = arith.subf %109, %15 : vector<1x128xf32>
    %111 = vector.shape_cast %110 : vector<1x128xf32> to vector<1x128xf32>
    %112 = vector.broadcast %111 : vector<1x128xf32> to vector<8x128xf32>
    %113 = arith.mulf %7, %112 : vector<8x128xf32>
    %114 = arith.addf %107, %113 : vector<8x128xf32>
    %c2_61 = arith.constant 2 : index
    %c4_62 = arith.constant 4 : index
    %c0_63 = arith.constant 0 : index
    %115 = vector.load %arg1[%c2_61, %c4_62, %c0_63] : memref<3x8x128xf32, #tpu.memory_space<vmem>>, vector<1x1x128xf32>
    %116 = vector.shape_cast %115 : vector<1x1x128xf32> to vector<1x128xf32>
    %117 = arith.subf %116, %17 : vector<1x128xf32>
    %118 = vector.shape_cast %117 : vector<1x128xf32> to vector<1x128xf32>
    %119 = vector.broadcast %118 : vector<1x128xf32> to vector<8x128xf32>
    %120 = arith.mulf %11, %119 : vector<8x128xf32>
    %121 = arith.addf %114, %120 : vector<8x128xf32>
    %c5 = arith.constant 5 : index
    %c0_64 = arith.constant 0 : index
    %c0_65 = arith.constant 0 : index
    %122 = vector.load %arg4[%c5, %c0_64, %c0_65] : memref<8x8x1xf32, #tpu.memory_space<vmem>>, vector<1x8x1xf32>
    %123 = vector.shape_cast %122 : vector<1x8x1xf32> to vector<8x1xf32>
    %124 = vector.shape_cast %123 : vector<8x1xf32> to vector<8x1xf32>
    %125 = vector.broadcast %124 : vector<8x1xf32> to vector<8x128xf32>
    %c0_66 = arith.constant 0 : index
    %c5_67 = arith.constant 5 : index
    %c0_68 = arith.constant 0 : index
    %126 = vector.load %arg1[%c0_66, %c5_67, %c0_68] : memref<3x8x128xf32, #tpu.memory_space<vmem>>, vector<1x1x128xf32>
    %127 = vector.shape_cast %126 : vector<1x1x128xf32> to vector<1x128xf32>
    %128 = arith.subf %127, %13 : vector<1x128xf32>
    %129 = vector.shape_cast %128 : vector<1x128xf32> to vector<1x128xf32>
    %130 = vector.broadcast %129 : vector<1x128xf32> to vector<8x128xf32>
    %131 = arith.mulf %3, %130 : vector<8x128xf32>
    %132 = arith.addf %125, %131 : vector<8x128xf32>
    %c1_69 = arith.constant 1 : index
    %c5_70 = arith.constant 5 : index
    %c0_71 = arith.constant 0 : index
    %133 = vector.load %arg1[%c1_69, %c5_70, %c0_71] : memref<3x8x128xf32, #tpu.memory_space<vmem>>, vector<1x1x128xf32>
    %134 = vector.shape_cast %133 : vector<1x1x128xf32> to vector<1x128xf32>
    %135 = arith.subf %134, %15 : vector<1x128xf32>
    %136 = vector.shape_cast %135 : vector<1x128xf32> to vector<1x128xf32>
    %137 = vector.broadcast %136 : vector<1x128xf32> to vector<8x128xf32>
    %138 = arith.mulf %7, %137 : vector<8x128xf32>
    %139 = arith.addf %132, %138 : vector<8x128xf32>
    %c2_72 = arith.constant 2 : index
    %c5_73 = arith.constant 5 : index
    %c0_74 = arith.constant 0 : index
    %140 = vector.load %arg1[%c2_72, %c5_73, %c0_74] : memref<3x8x128xf32, #tpu.memory_space<vmem>>, vector<1x1x128xf32>
    %141 = vector.shape_cast %140 : vector<1x1x128xf32> to vector<1x128xf32>
    %142 = arith.subf %141, %17 : vector<1x128xf32>
    %143 = vector.shape_cast %142 : vector<1x128xf32> to vector<1x128xf32>
    %144 = vector.broadcast %143 : vector<1x128xf32> to vector<8x128xf32>
    %145 = arith.mulf %11, %144 : vector<8x128xf32>
    %146 = arith.addf %139, %145 : vector<8x128xf32>
    %c6 = arith.constant 6 : index
    %c0_75 = arith.constant 0 : index
    %c0_76 = arith.constant 0 : index
    %147 = vector.load %arg4[%c6, %c0_75, %c0_76] : memref<8x8x1xf32, #tpu.memory_space<vmem>>, vector<1x8x1xf32>
    %148 = vector.shape_cast %147 : vector<1x8x1xf32> to vector<8x1xf32>
    %149 = vector.shape_cast %148 : vector<8x1xf32> to vector<8x1xf32>
    %150 = vector.broadcast %149 : vector<8x1xf32> to vector<8x128xf32>
    %c0_77 = arith.constant 0 : index
    %c6_78 = arith.constant 6 : index
    %c0_79 = arith.constant 0 : index
    %151 = vector.load %arg1[%c0_77, %c6_78, %c0_79] : memref<3x8x128xf32, #tpu.memory_space<vmem>>, vector<1x1x128xf32>
    %152 = vector.shape_cast %151 : vector<1x1x128xf32> to vector<1x128xf32>
    %153 = arith.subf %152, %13 : vector<1x128xf32>
    %154 = vector.shape_cast %153 : vector<1x128xf32> to vector<1x128xf32>
    %155 = vector.broadcast %154 : vector<1x128xf32> to vector<8x128xf32>
    %156 = arith.mulf %3, %155 : vector<8x128xf32>
    %157 = arith.addf %150, %156 : vector<8x128xf32>
    %c1_80 = arith.constant 1 : index
    %c6_81 = arith.constant 6 : index
    %c0_82 = arith.constant 0 : index
    %158 = vector.load %arg1[%c1_80, %c6_81, %c0_82] : memref<3x8x128xf32, #tpu.memory_space<vmem>>, vector<1x1x128xf32>
    %159 = vector.shape_cast %158 : vector<1x1x128xf32> to vector<1x128xf32>
    %160 = arith.subf %159, %15 : vector<1x128xf32>
    %161 = vector.shape_cast %160 : vector<1x128xf32> to vector<1x128xf32>
    %162 = vector.broadcast %161 : vector<1x128xf32> to vector<8x128xf32>
    %163 = arith.mulf %7, %162 : vector<8x128xf32>
    %164 = arith.addf %157, %163 : vector<8x128xf32>
    %c2_83 = arith.constant 2 : index
    %c6_84 = arith.constant 6 : index
    %c0_85 = arith.constant 0 : index
    %165 = vector.load %arg1[%c2_83, %c6_84, %c0_85] : memref<3x8x128xf32, #tpu.memory_space<vmem>>, vector<1x1x128xf32>
    %166 = vector.shape_cast %165 : vector<1x1x128xf32> to vector<1x128xf32>
    %167 = arith.subf %166, %17 : vector<1x128xf32>
    %168 = vector.shape_cast %167 : vector<1x128xf32> to vector<1x128xf32>
    %169 = vector.broadcast %168 : vector<1x128xf32> to vector<8x128xf32>
    %170 = arith.mulf %11, %169 : vector<8x128xf32>
    %171 = arith.addf %164, %170 : vector<8x128xf32>
    %c7 = arith.constant 7 : index
    %c0_86 = arith.constant 0 : index
    %c0_87 = arith.constant 0 : index
    %172 = vector.load %arg4[%c7, %c0_86, %c0_87] : memref<8x8x1xf32, #tpu.memory_space<vmem>>, vector<1x8x1xf32>
    %173 = vector.shape_cast %172 : vector<1x8x1xf32> to vector<8x1xf32>
    %174 = vector.shape_cast %173 : vector<8x1xf32> to vector<8x1xf32>
    %175 = vector.broadcast %174 : vector<8x1xf32> to vector<8x128xf32>
    %c0_88 = arith.constant 0 : index
    %c7_89 = arith.constant 7 : index
    %c0_90 = arith.constant 0 : index
    %176 = vector.load %arg1[%c0_88, %c7_89, %c0_90] : memref<3x8x128xf32, #tpu.memory_space<vmem>>, vector<1x1x128xf32>
    %177 = vector.shape_cast %176 : vector<1x1x128xf32> to vector<1x128xf32>
    %178 = arith.subf %177, %13 : vector<1x128xf32>
    %179 = vector.shape_cast %178 : vector<1x128xf32> to vector<1x128xf32>
    %180 = vector.broadcast %179 : vector<1x128xf32> to vector<8x128xf32>
    %181 = arith.mulf %3, %180 : vector<8x128xf32>
    %182 = arith.addf %175, %181 : vector<8x128xf32>
    %c1_91 = arith.constant 1 : index
    %c7_92 = arith.constant 7 : index
    %c0_93 = arith.constant 0 : index
    %183 = vector.load %arg1[%c1_91, %c7_92, %c0_93] : memref<3x8x128xf32, #tpu.memory_space<vmem>>, vector<1x1x128xf32>
    %184 = vector.shape_cast %183 : vector<1x1x128xf32> to vector<1x128xf32>
    %185 = arith.subf %184, %15 : vector<1x128xf32>
    %186 = vector.shape_cast %185 : vector<1x128xf32> to vector<1x128xf32>
    %187 = vector.broadcast %186 : vector<1x128xf32> to vector<8x128xf32>
    %188 = arith.mulf %7, %187 : vector<8x128xf32>
    %189 = arith.addf %182, %188 : vector<8x128xf32>
    %c2_94 = arith.constant 2 : index
    %c7_95 = arith.constant 7 : index
    %c0_96 = arith.constant 0 : index
    %190 = vector.load %arg1[%c2_94, %c7_95, %c0_96] : memref<3x8x128xf32, #tpu.memory_space<vmem>>, vector<1x1x128xf32>
    %191 = vector.shape_cast %190 : vector<1x1x128xf32> to vector<1x128xf32>
    %192 = arith.subf %191, %17 : vector<1x128xf32>
    %193 = vector.shape_cast %192 : vector<1x128xf32> to vector<1x128xf32>
    %194 = vector.broadcast %193 : vector<1x128xf32> to vector<8x128xf32>
    %195 = arith.mulf %11, %194 : vector<8x128xf32>
    %196 = arith.addf %189, %195 : vector<8x128xf32>
    %cst = arith.constant 0.000000e+00 : f32
    %197 = vector.broadcast %cst : f32 to vector<8x128xf32>
    %198 = arith.maximumf %21, %197 : vector<8x128xf32>
    %cst_97 = arith.constant 0.000000e+00 : f32
    %199 = vector.broadcast %cst_97 : f32 to vector<8x128xf32>
    %200 = arith.maximumf %46, %199 : vector<8x128xf32>
    %cst_98 = arith.constant 0.000000e+00 : f32
    %201 = vector.broadcast %cst_98 : f32 to vector<8x128xf32>
    %202 = arith.maximumf %71, %201 : vector<8x128xf32>
    %cst_99 = arith.constant 0.000000e+00 : f32
    %203 = vector.broadcast %cst_99 : f32 to vector<8x128xf32>
    %204 = arith.maximumf %96, %203 : vector<8x128xf32>
    %cst_100 = arith.constant 0.000000e+00 : f32
    %205 = vector.broadcast %cst_100 : f32 to vector<8x128xf32>
    %206 = arith.maximumf %121, %205 : vector<8x128xf32>
    %cst_101 = arith.constant 0.000000e+00 : f32
    %207 = vector.broadcast %cst_101 : f32 to vector<8x128xf32>
    %208 = arith.maximumf %146, %207 : vector<8x128xf32>
    %cst_102 = arith.constant 0.000000e+00 : f32
    %209 = vector.broadcast %cst_102 : f32 to vector<8x128xf32>
    %210 = arith.maximumf %171, %209 : vector<8x128xf32>
    %cst_103 = arith.constant 0.000000e+00 : f32
    %211 = vector.broadcast %cst_103 : f32 to vector<8x128xf32>
    %212 = arith.maximumf %196, %211 : vector<8x128xf32>
    %213 = arith.maximumf %198, %200 : vector<8x128xf32>
    %214 = arith.maximumf %213, %202 : vector<8x128xf32>
    %215 = arith.maximumf %214, %204 : vector<8x128xf32>
    %216 = arith.maximumf %215, %206 : vector<8x128xf32>
    %217 = arith.maximumf %216, %208 : vector<8x128xf32>
    %218 = arith.maximumf %217, %210 : vector<8x128xf32>
    %219 = arith.maximumf %218, %212 : vector<8x128xf32>
    %cst_104 = arith.constant 1.000000e-01 : f32
    %220 = vector.broadcast %cst_104 : f32 to vector<8x128xf32>
    %221 = arith.mulf %220, %219 : vector<8x128xf32>
    %222 = arith.cmpf ogt, %198, %221 : vector<8x128xf32>
    %cst_105 = arith.constant 0.000000e+00 : f32
    %223 = vector.broadcast %cst_105 : f32 to vector<8x128xf32>
    %224 = arith.select %222, %198, %223 : vector<8x128xi1>, vector<8x128xf32>
    %225 = arith.cmpf ogt, %200, %221 : vector<8x128xf32>
    %cst_106 = arith.constant 0.000000e+00 : f32
    %226 = vector.broadcast %cst_106 : f32 to vector<8x128xf32>
    %227 = arith.select %225, %200, %226 : vector<8x128xi1>, vector<8x128xf32>
    %228 = arith.cmpf ogt, %202, %221 : vector<8x128xf32>
    %cst_107 = arith.constant 0.000000e+00 : f32
    %229 = vector.broadcast %cst_107 : f32 to vector<8x128xf32>
    %230 = arith.select %228, %202, %229 : vector<8x128xi1>, vector<8x128xf32>
    %231 = arith.cmpf ogt, %204, %221 : vector<8x128xf32>
    %cst_108 = arith.constant 0.000000e+00 : f32
    %232 = vector.broadcast %cst_108 : f32 to vector<8x128xf32>
    %233 = arith.select %231, %204, %232 : vector<8x128xi1>, vector<8x128xf32>
    %234 = arith.cmpf ogt, %206, %221 : vector<8x128xf32>
    %cst_109 = arith.constant 0.000000e+00 : f32
    %235 = vector.broadcast %cst_109 : f32 to vector<8x128xf32>
    %236 = arith.select %234, %206, %235 : vector<8x128xi1>, vector<8x128xf32>
    %237 = arith.cmpf ogt, %208, %221 : vector<8x128xf32>
    %cst_110 = arith.constant 0.000000e+00 : f32
    %238 = vector.broadcast %cst_110 : f32 to vector<8x128xf32>
    %239 = arith.select %237, %208, %238 : vector<8x128xi1>, vector<8x128xf32>
    %240 = arith.cmpf ogt, %210, %221 : vector<8x128xf32>
    %cst_111 = arith.constant 0.000000e+00 : f32
    %241 = vector.broadcast %cst_111 : f32 to vector<8x128xf32>
    %242 = arith.select %240, %210, %241 : vector<8x128xi1>, vector<8x128xf32>
    %243 = arith.cmpf ogt, %212, %221 : vector<8x128xf32>
    %cst_112 = arith.constant 0.000000e+00 : f32
    %244 = vector.broadcast %cst_112 : f32 to vector<8x128xf32>
    %245 = arith.select %243, %212, %244 : vector<8x128xi1>, vector<8x128xf32>
    %246 = arith.addf %224, %227 : vector<8x128xf32>
    %247 = arith.addf %246, %230 : vector<8x128xf32>
    %248 = arith.addf %247, %233 : vector<8x128xf32>
    %249 = arith.addf %248, %236 : vector<8x128xf32>
    %250 = arith.addf %249, %239 : vector<8x128xf32>
    %251 = arith.addf %250, %242 : vector<8x128xf32>
    %252 = arith.addf %251, %245 : vector<8x128xf32>
    %cst_113 = arith.constant 9.99999997E-7 : f32
    %253 = vector.broadcast %cst_113 : f32 to vector<8x128xf32>
    %254 = arith.addf %252, %253 : vector<8x128xf32>
    %255 = tpu.reciprocal %254 {approx = true} : vector<8x128xf32> -> vector<8x128xf32>
    %256 = arith.mulf %252, %255 : vector<8x128xf32>
    %c0_114 = arith.constant 0 : index
    %c0_115 = arith.constant 0 : index
    %c0_116 = arith.constant 0 : index
    %257 = vector.load %arg2[%c0_114, %c0_115, %c0_116] : memref<4x8x128xf32, #tpu.memory_space<vmem>>, vector<1x1x128xf32>
    %258 = vector.shape_cast %257 : vector<1x1x128xf32> to vector<1x128xf32>
    %c1_117 = arith.constant 1 : index
    %c0_118 = arith.constant 0 : index
    %c0_119 = arith.constant 0 : index
    %259 = vector.load %arg2[%c1_117, %c0_118, %c0_119] : memref<4x8x128xf32, #tpu.memory_space<vmem>>, vector<1x1x128xf32>
    %260 = vector.shape_cast %259 : vector<1x1x128xf32> to vector<1x128xf32>
    %c2_120 = arith.constant 2 : index
    %c0_121 = arith.constant 0 : index
    %c0_122 = arith.constant 0 : index
    %261 = vector.load %arg2[%c2_120, %c0_121, %c0_122] : memref<4x8x128xf32, #tpu.memory_space<vmem>>, vector<1x1x128xf32>
    %262 = vector.shape_cast %261 : vector<1x1x128xf32> to vector<1x128xf32>
    %c3_123 = arith.constant 3 : index
    %c0_124 = arith.constant 0 : index
    %c0_125 = arith.constant 0 : index
    %263 = vector.load %arg2[%c3_123, %c0_124, %c0_125] : memref<4x8x128xf32, #tpu.memory_space<vmem>>, vector<1x1x128xf32>
    %264 = vector.shape_cast %263 : vector<1x1x128xf32> to vector<1x128xf32>
    %265 = arith.mulf %227, %255 : vector<8x128xf32>
    %c0_126 = arith.constant 0 : index
    %c1_127 = arith.constant 1 : index
    %c0_128 = arith.constant 0 : index
    %266 = vector.load %arg2[%c0_126, %c1_127, %c0_128] : memref<4x8x128xf32, #tpu.memory_space<vmem>>, vector<1x1x128xf32>
    %267 = vector.shape_cast %266 : vector<1x1x128xf32> to vector<1x128xf32>
    %268 = arith.subf %267, %258 : vector<1x128xf32>
    %269 = vector.shape_cast %268 : vector<1x128xf32> to vector<1x128xf32>
    %270 = vector.broadcast %269 : vector<1x128xf32> to vector<8x128xf32>
    %271 = arith.mulf %270, %265 : vector<8x128xf32>
    %c1_129 = arith.constant 1 : index
    %c1_130 = arith.constant 1 : index
    %c0_131 = arith.constant 0 : index
    %272 = vector.load %arg2[%c1_129, %c1_130, %c0_131] : memref<4x8x128xf32, #tpu.memory_space<vmem>>, vector<1x1x128xf32>
    %273 = vector.shape_cast %272 : vector<1x1x128xf32> to vector<1x128xf32>
    %274 = arith.subf %273, %260 : vector<1x128xf32>
    %275 = vector.shape_cast %274 : vector<1x128xf32> to vector<1x128xf32>
    %276 = vector.broadcast %275 : vector<1x128xf32> to vector<8x128xf32>
    %277 = arith.mulf %276, %265 : vector<8x128xf32>
    %c2_132 = arith.constant 2 : index
    %c1_133 = arith.constant 1 : index
    %c0_134 = arith.constant 0 : index
    %278 = vector.load %arg2[%c2_132, %c1_133, %c0_134] : memref<4x8x128xf32, #tpu.memory_space<vmem>>, vector<1x1x128xf32>
    %279 = vector.shape_cast %278 : vector<1x1x128xf32> to vector<1x128xf32>
    %280 = arith.subf %279, %262 : vector<1x128xf32>
    %281 = vector.shape_cast %280 : vector<1x128xf32> to vector<1x128xf32>
    %282 = vector.broadcast %281 : vector<1x128xf32> to vector<8x128xf32>
    %283 = arith.mulf %282, %265 : vector<8x128xf32>
    %c3_135 = arith.constant 3 : index
    %c1_136 = arith.constant 1 : index
    %c0_137 = arith.constant 0 : index
    %284 = vector.load %arg2[%c3_135, %c1_136, %c0_137] : memref<4x8x128xf32, #tpu.memory_space<vmem>>, vector<1x1x128xf32>
    %285 = vector.shape_cast %284 : vector<1x1x128xf32> to vector<1x128xf32>
    %286 = arith.subf %285, %264 : vector<1x128xf32>
    %287 = vector.shape_cast %286 : vector<1x128xf32> to vector<1x128xf32>
    %288 = vector.broadcast %287 : vector<1x128xf32> to vector<8x128xf32>
    %289 = arith.mulf %288, %265 : vector<8x128xf32>
    %290 = arith.mulf %230, %255 : vector<8x128xf32>
    %c0_138 = arith.constant 0 : index
    %c2_139 = arith.constant 2 : index
    %c0_140 = arith.constant 0 : index
    %291 = vector.load %arg2[%c0_138, %c2_139, %c0_140] : memref<4x8x128xf32, #tpu.memory_space<vmem>>, vector<1x1x128xf32>
    %292 = vector.shape_cast %291 : vector<1x1x128xf32> to vector<1x128xf32>
    %293 = arith.subf %292, %258 : vector<1x128xf32>
    %294 = vector.shape_cast %293 : vector<1x128xf32> to vector<1x128xf32>
    %295 = vector.broadcast %294 : vector<1x128xf32> to vector<8x128xf32>
    %296 = arith.mulf %295, %290 : vector<8x128xf32>
    %297 = arith.addf %271, %296 : vector<8x128xf32>
    %c1_141 = arith.constant 1 : index
    %c2_142 = arith.constant 2 : index
    %c0_143 = arith.constant 0 : index
    %298 = vector.load %arg2[%c1_141, %c2_142, %c0_143] : memref<4x8x128xf32, #tpu.memory_space<vmem>>, vector<1x1x128xf32>
    %299 = vector.shape_cast %298 : vector<1x1x128xf32> to vector<1x128xf32>
    %300 = arith.subf %299, %260 : vector<1x128xf32>
    %301 = vector.shape_cast %300 : vector<1x128xf32> to vector<1x128xf32>
    %302 = vector.broadcast %301 : vector<1x128xf32> to vector<8x128xf32>
    %303 = arith.mulf %302, %290 : vector<8x128xf32>
    %304 = arith.addf %277, %303 : vector<8x128xf32>
    %c2_144 = arith.constant 2 : index
    %c2_145 = arith.constant 2 : index
    %c0_146 = arith.constant 0 : index
    %305 = vector.load %arg2[%c2_144, %c2_145, %c0_146] : memref<4x8x128xf32, #tpu.memory_space<vmem>>, vector<1x1x128xf32>
    %306 = vector.shape_cast %305 : vector<1x1x128xf32> to vector<1x128xf32>
    %307 = arith.subf %306, %262 : vector<1x128xf32>
    %308 = vector.shape_cast %307 : vector<1x128xf32> to vector<1x128xf32>
    %309 = vector.broadcast %308 : vector<1x128xf32> to vector<8x128xf32>
    %310 = arith.mulf %309, %290 : vector<8x128xf32>
    %311 = arith.addf %283, %310 : vector<8x128xf32>
    %c3_147 = arith.constant 3 : index
    %c2_148 = arith.constant 2 : index
    %c0_149 = arith.constant 0 : index
    %312 = vector.load %arg2[%c3_147, %c2_148, %c0_149] : memref<4x8x128xf32, #tpu.memory_space<vmem>>, vector<1x1x128xf32>
    %313 = vector.shape_cast %312 : vector<1x1x128xf32> to vector<1x128xf32>
    %314 = arith.subf %313, %264 : vector<1x128xf32>
    %315 = vector.shape_cast %314 : vector<1x128xf32> to vector<1x128xf32>
    %316 = vector.broadcast %315 : vector<1x128xf32> to vector<8x128xf32>
    %317 = arith.mulf %316, %290 : vector<8x128xf32>
    %318 = arith.addf %289, %317 : vector<8x128xf32>
    %319 = arith.mulf %233, %255 : vector<8x128xf32>
    %c0_150 = arith.constant 0 : index
    %c3_151 = arith.constant 3 : index
    %c0_152 = arith.constant 0 : index
    %320 = vector.load %arg2[%c0_150, %c3_151, %c0_152] : memref<4x8x128xf32, #tpu.memory_space<vmem>>, vector<1x1x128xf32>
    %321 = vector.shape_cast %320 : vector<1x1x128xf32> to vector<1x128xf32>
    %322 = arith.subf %321, %258 : vector<1x128xf32>
    %323 = vector.shape_cast %322 : vector<1x128xf32> to vector<1x128xf32>
    %324 = vector.broadcast %323 : vector<1x128xf32> to vector<8x128xf32>
    %325 = arith.mulf %324, %319 : vector<8x128xf32>
    %326 = arith.addf %297, %325 : vector<8x128xf32>
    %c1_153 = arith.constant 1 : index
    %c3_154 = arith.constant 3 : index
    %c0_155 = arith.constant 0 : index
    %327 = vector.load %arg2[%c1_153, %c3_154, %c0_155] : memref<4x8x128xf32, #tpu.memory_space<vmem>>, vector<1x1x128xf32>
    %328 = vector.shape_cast %327 : vector<1x1x128xf32> to vector<1x128xf32>
    %329 = arith.subf %328, %260 : vector<1x128xf32>
    %330 = vector.shape_cast %329 : vector<1x128xf32> to vector<1x128xf32>
    %331 = vector.broadcast %330 : vector<1x128xf32> to vector<8x128xf32>
    %332 = arith.mulf %331, %319 : vector<8x128xf32>
    %333 = arith.addf %304, %332 : vector<8x128xf32>
    %c2_156 = arith.constant 2 : index
    %c3_157 = arith.constant 3 : index
    %c0_158 = arith.constant 0 : index
    %334 = vector.load %arg2[%c2_156, %c3_157, %c0_158] : memref<4x8x128xf32, #tpu.memory_space<vmem>>, vector<1x1x128xf32>
    %335 = vector.shape_cast %334 : vector<1x1x128xf32> to vector<1x128xf32>
    %336 = arith.subf %335, %262 : vector<1x128xf32>
    %337 = vector.shape_cast %336 : vector<1x128xf32> to vector<1x128xf32>
    %338 = vector.broadcast %337 : vector<1x128xf32> to vector<8x128xf32>
    %339 = arith.mulf %338, %319 : vector<8x128xf32>
    %340 = arith.addf %311, %339 : vector<8x128xf32>
    %c3_159 = arith.constant 3 : index
    %c3_160 = arith.constant 3 : index
    %c0_161 = arith.constant 0 : index
    %341 = vector.load %arg2[%c3_159, %c3_160, %c0_161] : memref<4x8x128xf32, #tpu.memory_space<vmem>>, vector<1x1x128xf32>
    %342 = vector.shape_cast %341 : vector<1x1x128xf32> to vector<1x128xf32>
    %343 = arith.subf %342, %264 : vector<1x128xf32>
    %344 = vector.shape_cast %343 : vector<1x128xf32> to vector<1x128xf32>
    %345 = vector.broadcast %344 : vector<1x128xf32> to vector<8x128xf32>
    %346 = arith.mulf %345, %319 : vector<8x128xf32>
    %347 = arith.addf %318, %346 : vector<8x128xf32>
    %348 = arith.mulf %236, %255 : vector<8x128xf32>
    %c0_162 = arith.constant 0 : index
    %c4_163 = arith.constant 4 : index
    %c0_164 = arith.constant 0 : index
    %349 = vector.load %arg2[%c0_162, %c4_163, %c0_164] : memref<4x8x128xf32, #tpu.memory_space<vmem>>, vector<1x1x128xf32>
    %350 = vector.shape_cast %349 : vector<1x1x128xf32> to vector<1x128xf32>
    %351 = arith.subf %350, %258 : vector<1x128xf32>
    %352 = vector.shape_cast %351 : vector<1x128xf32> to vector<1x128xf32>
    %353 = vector.broadcast %352 : vector<1x128xf32> to vector<8x128xf32>
    %354 = arith.mulf %353, %348 : vector<8x128xf32>
    %355 = arith.addf %326, %354 : vector<8x128xf32>
    %c1_165 = arith.constant 1 : index
    %c4_166 = arith.constant 4 : index
    %c0_167 = arith.constant 0 : index
    %356 = vector.load %arg2[%c1_165, %c4_166, %c0_167] : memref<4x8x128xf32, #tpu.memory_space<vmem>>, vector<1x1x128xf32>
    %357 = vector.shape_cast %356 : vector<1x1x128xf32> to vector<1x128xf32>
    %358 = arith.subf %357, %260 : vector<1x128xf32>
    %359 = vector.shape_cast %358 : vector<1x128xf32> to vector<1x128xf32>
    %360 = vector.broadcast %359 : vector<1x128xf32> to vector<8x128xf32>
    %361 = arith.mulf %360, %348 : vector<8x128xf32>
    %362 = arith.addf %333, %361 : vector<8x128xf32>
    %c2_168 = arith.constant 2 : index
    %c4_169 = arith.constant 4 : index
    %c0_170 = arith.constant 0 : index
    %363 = vector.load %arg2[%c2_168, %c4_169, %c0_170] : memref<4x8x128xf32, #tpu.memory_space<vmem>>, vector<1x1x128xf32>
    %364 = vector.shape_cast %363 : vector<1x1x128xf32> to vector<1x128xf32>
    %365 = arith.subf %364, %262 : vector<1x128xf32>
    %366 = vector.shape_cast %365 : vector<1x128xf32> to vector<1x128xf32>
    %367 = vector.broadcast %366 : vector<1x128xf32> to vector<8x128xf32>
    %368 = arith.mulf %367, %348 : vector<8x128xf32>
    %369 = arith.addf %340, %368 : vector<8x128xf32>
    %c3_171 = arith.constant 3 : index
    %c4_172 = arith.constant 4 : index
    %c0_173 = arith.constant 0 : index
    %370 = vector.load %arg2[%c3_171, %c4_172, %c0_173] : memref<4x8x128xf32, #tpu.memory_space<vmem>>, vector<1x1x128xf32>
    %371 = vector.shape_cast %370 : vector<1x1x128xf32> to vector<1x128xf32>
    %372 = arith.subf %371, %264 : vector<1x128xf32>
    %373 = vector.shape_cast %372 : vector<1x128xf32> to vector<1x128xf32>
    %374 = vector.broadcast %373 : vector<1x128xf32> to vector<8x128xf32>
    %375 = arith.mulf %374, %348 : vector<8x128xf32>
    %376 = arith.addf %347, %375 : vector<8x128xf32>
    %377 = arith.mulf %239, %255 : vector<8x128xf32>
    %c0_174 = arith.constant 0 : index
    %c5_175 = arith.constant 5 : index
    %c0_176 = arith.constant 0 : index
    %378 = vector.load %arg2[%c0_174, %c5_175, %c0_176] : memref<4x8x128xf32, #tpu.memory_space<vmem>>, vector<1x1x128xf32>
    %379 = vector.shape_cast %378 : vector<1x1x128xf32> to vector<1x128xf32>
    %380 = arith.subf %379, %258 : vector<1x128xf32>
    %381 = vector.shape_cast %380 : vector<1x128xf32> to vector<1x128xf32>
    %382 = vector.broadcast %381 : vector<1x128xf32> to vector<8x128xf32>
    %383 = arith.mulf %382, %377 : vector<8x128xf32>
    %384 = arith.addf %355, %383 : vector<8x128xf32>
    %c1_177 = arith.constant 1 : index
    %c5_178 = arith.constant 5 : index
    %c0_179 = arith.constant 0 : index
    %385 = vector.load %arg2[%c1_177, %c5_178, %c0_179] : memref<4x8x128xf32, #tpu.memory_space<vmem>>, vector<1x1x128xf32>
    %386 = vector.shape_cast %385 : vector<1x1x128xf32> to vector<1x128xf32>
    %387 = arith.subf %386, %260 : vector<1x128xf32>
    %388 = vector.shape_cast %387 : vector<1x128xf32> to vector<1x128xf32>
    %389 = vector.broadcast %388 : vector<1x128xf32> to vector<8x128xf32>
    %390 = arith.mulf %389, %377 : vector<8x128xf32>
    %391 = arith.addf %362, %390 : vector<8x128xf32>
    %c2_180 = arith.constant 2 : index
    %c5_181 = arith.constant 5 : index
    %c0_182 = arith.constant 0 : index
    %392 = vector.load %arg2[%c2_180, %c5_181, %c0_182] : memref<4x8x128xf32, #tpu.memory_space<vmem>>, vector<1x1x128xf32>
    %393 = vector.shape_cast %392 : vector<1x1x128xf32> to vector<1x128xf32>
    %394 = arith.subf %393, %262 : vector<1x128xf32>
    %395 = vector.shape_cast %394 : vector<1x128xf32> to vector<1x128xf32>
    %396 = vector.broadcast %395 : vector<1x128xf32> to vector<8x128xf32>
    %397 = arith.mulf %396, %377 : vector<8x128xf32>
    %398 = arith.addf %369, %397 : vector<8x128xf32>
    %c3_183 = arith.constant 3 : index
    %c5_184 = arith.constant 5 : index
    %c0_185 = arith.constant 0 : index
    %399 = vector.load %arg2[%c3_183, %c5_184, %c0_185] : memref<4x8x128xf32, #tpu.memory_space<vmem>>, vector<1x1x128xf32>
    %400 = vector.shape_cast %399 : vector<1x1x128xf32> to vector<1x128xf32>
    %401 = arith.subf %400, %264 : vector<1x128xf32>
    %402 = vector.shape_cast %401 : vector<1x128xf32> to vector<1x128xf32>
    %403 = vector.broadcast %402 : vector<1x128xf32> to vector<8x128xf32>
    %404 = arith.mulf %403, %377 : vector<8x128xf32>
    %405 = arith.addf %376, %404 : vector<8x128xf32>
    %406 = arith.mulf %242, %255 : vector<8x128xf32>
    %c0_186 = arith.constant 0 : index
    %c6_187 = arith.constant 6 : index
    %c0_188 = arith.constant 0 : index
    %407 = vector.load %arg2[%c0_186, %c6_187, %c0_188] : memref<4x8x128xf32, #tpu.memory_space<vmem>>, vector<1x1x128xf32>
    %408 = vector.shape_cast %407 : vector<1x1x128xf32> to vector<1x128xf32>
    %409 = arith.subf %408, %258 : vector<1x128xf32>
    %410 = vector.shape_cast %409 : vector<1x128xf32> to vector<1x128xf32>
    %411 = vector.broadcast %410 : vector<1x128xf32> to vector<8x128xf32>
    %412 = arith.mulf %411, %406 : vector<8x128xf32>
    %413 = arith.addf %384, %412 : vector<8x128xf32>
    %c1_189 = arith.constant 1 : index
    %c6_190 = arith.constant 6 : index
    %c0_191 = arith.constant 0 : index
    %414 = vector.load %arg2[%c1_189, %c6_190, %c0_191] : memref<4x8x128xf32, #tpu.memory_space<vmem>>, vector<1x1x128xf32>
    %415 = vector.shape_cast %414 : vector<1x1x128xf32> to vector<1x128xf32>
    %416 = arith.subf %415, %260 : vector<1x128xf32>
    %417 = vector.shape_cast %416 : vector<1x128xf32> to vector<1x128xf32>
    %418 = vector.broadcast %417 : vector<1x128xf32> to vector<8x128xf32>
    %419 = arith.mulf %418, %406 : vector<8x128xf32>
    %420 = arith.addf %391, %419 : vector<8x128xf32>
    %c2_192 = arith.constant 2 : index
    %c6_193 = arith.constant 6 : index
    %c0_194 = arith.constant 0 : index
    %421 = vector.load %arg2[%c2_192, %c6_193, %c0_194] : memref<4x8x128xf32, #tpu.memory_space<vmem>>, vector<1x1x128xf32>
    %422 = vector.shape_cast %421 : vector<1x1x128xf32> to vector<1x128xf32>
    %423 = arith.subf %422, %262 : vector<1x128xf32>
    %424 = vector.shape_cast %423 : vector<1x128xf32> to vector<1x128xf32>
    %425 = vector.broadcast %424 : vector<1x128xf32> to vector<8x128xf32>
    %426 = arith.mulf %425, %406 : vector<8x128xf32>
    %427 = arith.addf %398, %426 : vector<8x128xf32>
    %c3_195 = arith.constant 3 : index
    %c6_196 = arith.constant 6 : index
    %c0_197 = arith.constant 0 : index
    %428 = vector.load %arg2[%c3_195, %c6_196, %c0_197] : memref<4x8x128xf32, #tpu.memory_space<vmem>>, vector<1x1x128xf32>
    %429 = vector.shape_cast %428 : vector<1x1x128xf32> to vector<1x128xf32>
    %430 = arith.subf %429, %264 : vector<1x128xf32>
    %431 = vector.shape_cast %430 : vector<1x128xf32> to vector<1x128xf32>
    %432 = vector.broadcast %431 : vector<1x128xf32> to vector<8x128xf32>
    %433 = arith.mulf %432, %406 : vector<8x128xf32>
    %434 = arith.addf %405, %433 : vector<8x128xf32>
    %435 = arith.mulf %245, %255 : vector<8x128xf32>
    %c0_198 = arith.constant 0 : index
    %c7_199 = arith.constant 7 : index
    %c0_200 = arith.constant 0 : index
    %436 = vector.load %arg2[%c0_198, %c7_199, %c0_200] : memref<4x8x128xf32, #tpu.memory_space<vmem>>, vector<1x1x128xf32>
    %437 = vector.shape_cast %436 : vector<1x1x128xf32> to vector<1x128xf32>
    %438 = arith.subf %437, %258 : vector<1x128xf32>
    %439 = vector.shape_cast %438 : vector<1x128xf32> to vector<1x128xf32>
    %440 = vector.broadcast %439 : vector<1x128xf32> to vector<8x128xf32>
    %441 = arith.mulf %440, %435 : vector<8x128xf32>
    %442 = arith.addf %413, %441 : vector<8x128xf32>
    %c1_201 = arith.constant 1 : index
    %c7_202 = arith.constant 7 : index
    %c0_203 = arith.constant 0 : index
    %443 = vector.load %arg2[%c1_201, %c7_202, %c0_203] : memref<4x8x128xf32, #tpu.memory_space<vmem>>, vector<1x1x128xf32>
    %444 = vector.shape_cast %443 : vector<1x1x128xf32> to vector<1x128xf32>
    %445 = arith.subf %444, %260 : vector<1x128xf32>
    %446 = vector.shape_cast %445 : vector<1x128xf32> to vector<1x128xf32>
    %447 = vector.broadcast %446 : vector<1x128xf32> to vector<8x128xf32>
    %448 = arith.mulf %447, %435 : vector<8x128xf32>
    %449 = arith.addf %420, %448 : vector<8x128xf32>
    %c2_204 = arith.constant 2 : index
    %c7_205 = arith.constant 7 : index
    %c0_206 = arith.constant 0 : index
    %450 = vector.load %arg2[%c2_204, %c7_205, %c0_206] : memref<4x8x128xf32, #tpu.memory_space<vmem>>, vector<1x1x128xf32>
    %451 = vector.shape_cast %450 : vector<1x1x128xf32> to vector<1x128xf32>
    %452 = arith.subf %451, %262 : vector<1x128xf32>
    %453 = vector.shape_cast %452 : vector<1x128xf32> to vector<1x128xf32>
    %454 = vector.broadcast %453 : vector<1x128xf32> to vector<8x128xf32>
    %455 = arith.mulf %454, %435 : vector<8x128xf32>
    %456 = arith.addf %427, %455 : vector<8x128xf32>
    %c3_207 = arith.constant 3 : index
    %c7_208 = arith.constant 7 : index
    %c0_209 = arith.constant 0 : index
    %457 = vector.load %arg2[%c3_207, %c7_208, %c0_209] : memref<4x8x128xf32, #tpu.memory_space<vmem>>, vector<1x1x128xf32>
    %458 = vector.shape_cast %457 : vector<1x1x128xf32> to vector<1x128xf32>
    %459 = arith.subf %458, %264 : vector<1x128xf32>
    %460 = vector.shape_cast %459 : vector<1x128xf32> to vector<1x128xf32>
    %461 = vector.broadcast %460 : vector<1x128xf32> to vector<8x128xf32>
    %462 = arith.mulf %461, %435 : vector<8x128xf32>
    %463 = arith.addf %434, %462 : vector<8x128xf32>
    %c0_210 = arith.constant 0 : index
    %c0_211 = arith.constant 0 : index
    %464 = vector.load %arg5[%c0_210, %c0_211] : memref<4x8xf32, #tpu.memory_space<vmem>>, vector<1x1xf32>
    %465 = vector.broadcast %464 : vector<1x1xf32> to vector<1x128xf32>
    %466 = arith.mulf %465, %258 : vector<1x128xf32>
    %c0_212 = arith.constant 0 : index
    %c1_213 = arith.constant 1 : index
    %467 = vector.load %arg5[%c0_212, %c1_213] : memref<4x8xf32, #tpu.memory_space<vmem>>, vector<1x1xf32>
    %468 = vector.broadcast %467 : vector<1x1xf32> to vector<1x128xf32>
    %469 = arith.mulf %468, %260 : vector<1x128xf32>
    %470 = arith.addf %466, %469 : vector<1x128xf32>
    %c0_214 = arith.constant 0 : index
    %c2_215 = arith.constant 2 : index
    %471 = vector.load %arg5[%c0_214, %c2_215] : memref<4x8xf32, #tpu.memory_space<vmem>>, vector<1x1xf32>
    %472 = vector.broadcast %471 : vector<1x1xf32> to vector<1x128xf32>
    %473 = arith.mulf %472, %262 : vector<1x128xf32>
    %474 = arith.addf %470, %473 : vector<1x128xf32>
    %c0_216 = arith.constant 0 : index
    %c3_217 = arith.constant 3 : index
    %475 = vector.load %arg5[%c0_216, %c3_217] : memref<4x8xf32, #tpu.memory_space<vmem>>, vector<1x1xf32>
    %476 = vector.broadcast %475 : vector<1x1xf32> to vector<1x128xf32>
    %477 = arith.mulf %476, %264 : vector<1x128xf32>
    %478 = arith.addf %474, %477 : vector<1x128xf32>
    %479 = vector.shape_cast %478 : vector<1x128xf32> to vector<1x128xf32>
    %480 = vector.broadcast %479 : vector<1x128xf32> to vector<8x128xf32>
    %481 = arith.mulf %480, %256 : vector<8x128xf32>
    %c0_218 = arith.constant 0 : index
    %c4_219 = arith.constant 4 : index
    %482 = vector.load %arg5[%c0_218, %c4_219] : memref<4x8xf32, #tpu.memory_space<vmem>>, vector<1x1xf32>
    %483 = vector.broadcast %482 : vector<1x1xf32> to vector<8x128xf32>
    %484 = arith.mulf %483, %442 : vector<8x128xf32>
    %485 = arith.addf %481, %484 : vector<8x128xf32>
    %c0_220 = arith.constant 0 : index
    %c5_221 = arith.constant 5 : index
    %486 = vector.load %arg5[%c0_220, %c5_221] : memref<4x8xf32, #tpu.memory_space<vmem>>, vector<1x1xf32>
    %487 = vector.broadcast %486 : vector<1x1xf32> to vector<8x128xf32>
    %488 = arith.mulf %487, %449 : vector<8x128xf32>
    %489 = arith.addf %485, %488 : vector<8x128xf32>
    %c0_222 = arith.constant 0 : index
    %c6_223 = arith.constant 6 : index
    %490 = vector.load %arg5[%c0_222, %c6_223] : memref<4x8xf32, #tpu.memory_space<vmem>>, vector<1x1xf32>
    %491 = vector.broadcast %490 : vector<1x1xf32> to vector<8x128xf32>
    %492 = arith.mulf %491, %456 : vector<8x128xf32>
    %493 = arith.addf %489, %492 : vector<8x128xf32>
    %c0_224 = arith.constant 0 : index
    %c7_225 = arith.constant 7 : index
    %494 = vector.load %arg5[%c0_224, %c7_225] : memref<4x8xf32, #tpu.memory_space<vmem>>, vector<1x1xf32>
    %495 = vector.broadcast %494 : vector<1x1xf32> to vector<8x128xf32>
    %496 = arith.mulf %495, %463 : vector<8x128xf32>
    %497 = arith.addf %493, %496 : vector<8x128xf32>
    %cst_226 = arith.constant dense<0xFF800000> : vector<128xf32>
    %498 = vector.multi_reduction <maximumf>, %497, %cst_226 [0] : vector<8x128xf32> to vector<128xf32>
    %499 = vector.shape_cast %498 : vector<128xf32> to vector<1x128xf32>
    %c0_227 = arith.constant 0 : index
    %c0_228 = arith.constant 0 : index
    %500 = vector.load %arg6[%c0_227, %c0_228] : memref<4x1xf32, #tpu.memory_space<vmem>>, vector<1x1xf32>
    %501 = vector.broadcast %500 : vector<1x1xf32> to vector<1x128xf32>
    %502 = arith.addf %499, %501 : vector<1x128xf32>
    %c0_229 = arith.constant 0 : index
    %c0_230 = arith.constant 0 : index
    %503 = vector.load %arg7[%c0_229, %c0_230] : memref<4x128xf32, #tpu.memory_space<vmem>>, vector<1x128xf32>
    tpu.vector_store %arg7[%c0_229, %c0_230], %502 {strides = array<i32>} : memref<4x128xf32, #tpu.memory_space<vmem>>, vector<1x128xf32>,
    %c1_231 = arith.constant 1 : index
    %c0_232 = arith.constant 0 : index
    %504 = vector.load %arg5[%c1_231, %c0_232] : memref<4x8xf32, #tpu.memory_space<vmem>>, vector<1x1xf32>
    %505 = vector.broadcast %504 : vector<1x1xf32> to vector<1x128xf32>
    %506 = arith.mulf %505, %258 : vector<1x128xf32>
    %c1_233 = arith.constant 1 : index
    %c1_234 = arith.constant 1 : index
    %507 = vector.load %arg5[%c1_233, %c1_234] : memref<4x8xf32, #tpu.memory_space<vmem>>, vector<1x1xf32>
    %508 = vector.broadcast %507 : vector<1x1xf32> to vector<1x128xf32>
    %509 = arith.mulf %508, %260 : vector<1x128xf32>
    %510 = arith.addf %506, %509 : vector<1x128xf32>
    %c1_235 = arith.constant 1 : index
    %c2_236 = arith.constant 2 : index
    %511 = vector.load %arg5[%c1_235, %c2_236] : memref<4x8xf32, #tpu.memory_space<vmem>>, vector<1x1xf32>
    %512 = vector.broadcast %511 : vector<1x1xf32> to vector<1x128xf32>
    %513 = arith.mulf %512, %262 : vector<1x128xf32>
    %514 = arith.addf %510, %513 : vector<1x128xf32>
    %c1_237 = arith.constant 1 : index
    %c3_238 = arith.constant 3 : index
    %515 = vector.load %arg5[%c1_237, %c3_238] : memref<4x8xf32, #tpu.memory_space<vmem>>, vector<1x1xf32>
    %516 = vector.broadcast %515 : vector<1x1xf32> to vector<1x128xf32>
    %517 = arith.mulf %516, %264 : vector<1x128xf32>
    %518 = arith.addf %514, %517 : vector<1x128xf32>
    %519 = vector.shape_cast %518 : vector<1x128xf32> to vector<1x128xf32>
    %520 = vector.broadcast %519 : vector<1x128xf32> to vector<8x128xf32>
    %521 = arith.mulf %520, %256 : vector<8x128xf32>
    %c1_239 = arith.constant 1 : index
    %c4_240 = arith.constant 4 : index
    %522 = vector.load %arg5[%c1_239, %c4_240] : memref<4x8xf32, #tpu.memory_space<vmem>>, vector<1x1xf32>
    %523 = vector.broadcast %522 : vector<1x1xf32> to vector<8x128xf32>
    %524 = arith.mulf %523, %442 : vector<8x128xf32>
    %525 = arith.addf %521, %524 : vector<8x128xf32>
    %c1_241 = arith.constant 1 : index
    %c5_242 = arith.constant 5 : index
    %526 = vector.load %arg5[%c1_241, %c5_242] : memref<4x8xf32, #tpu.memory_space<vmem>>, vector<1x1xf32>
    %527 = vector.broadcast %526 : vector<1x1xf32> to vector<8x128xf32>
    %528 = arith.mulf %527, %449 : vector<8x128xf32>
    %529 = arith.addf %525, %528 : vector<8x128xf32>
    %c1_243 = arith.constant 1 : index
    %c6_244 = arith.constant 6 : index
    %530 = vector.load %arg5[%c1_243, %c6_244] : memref<4x8xf32, #tpu.memory_space<vmem>>, vector<1x1xf32>
    %531 = vector.broadcast %530 : vector<1x1xf32> to vector<8x128xf32>
    %532 = arith.mulf %531, %456 : vector<8x128xf32>
    %533 = arith.addf %529, %532 : vector<8x128xf32>
    %c1_245 = arith.constant 1 : index
    %c7_246 = arith.constant 7 : index
    %534 = vector.load %arg5[%c1_245, %c7_246] : memref<4x8xf32, #tpu.memory_space<vmem>>, vector<1x1xf32>
    %535 = vector.broadcast %534 : vector<1x1xf32> to vector<8x128xf32>
    %536 = arith.mulf %535, %463 : vector<8x128xf32>
    %537 = arith.addf %533, %536 : vector<8x128xf32>
    %cst_247 = arith.constant dense<0xFF800000> : vector<128xf32>
    %538 = vector.multi_reduction <maximumf>, %537, %cst_247 [0] : vector<8x128xf32> to vector<128xf32>
    %539 = vector.shape_cast %538 : vector<128xf32> to vector<1x128xf32>
    %c1_248 = arith.constant 1 : index
    %c0_249 = arith.constant 0 : index
    %540 = vector.load %arg6[%c1_248, %c0_249] : memref<4x1xf32, #tpu.memory_space<vmem>>, vector<1x1xf32>
    %541 = vector.broadcast %540 : vector<1x1xf32> to vector<1x128xf32>
    %542 = arith.addf %539, %541 : vector<1x128xf32>
    %c1_250 = arith.constant 1 : index
    %c0_251 = arith.constant 0 : index
    %543 = vector.load %arg7[%c1_250, %c0_251] : memref<4x128xf32, #tpu.memory_space<vmem>>, vector<1x128xf32>
    tpu.vector_store %arg7[%c1_250, %c0_251], %542 {strides = array<i32>} : memref<4x128xf32, #tpu.memory_space<vmem>>, vector<1x128xf32>,
    %c2_252 = arith.constant 2 : index
    %c0_253 = arith.constant 0 : index
    %544 = vector.load %arg5[%c2_252, %c0_253] : memref<4x8xf32, #tpu.memory_space<vmem>>, vector<1x1xf32>
    %545 = vector.broadcast %544 : vector<1x1xf32> to vector<1x128xf32>
    %546 = arith.mulf %545, %258 : vector<1x128xf32>
    %c2_254 = arith.constant 2 : index
    %c1_255 = arith.constant 1 : index
    %547 = vector.load %arg5[%c2_254, %c1_255] : memref<4x8xf32, #tpu.memory_space<vmem>>, vector<1x1xf32>
    %548 = vector.broadcast %547 : vector<1x1xf32> to vector<1x128xf32>
    %549 = arith.mulf %548, %260 : vector<1x128xf32>
    %550 = arith.addf %546, %549 : vector<1x128xf32>
    %c2_256 = arith.constant 2 : index
    %c2_257 = arith.constant 2 : index
    %551 = vector.load %arg5[%c2_256, %c2_257] : memref<4x8xf32, #tpu.memory_space<vmem>>, vector<1x1xf32>
    %552 = vector.broadcast %551 : vector<1x1xf32> to vector<1x128xf32>
    %553 = arith.mulf %552, %262 : vector<1x128xf32>
    %554 = arith.addf %550, %553 : vector<1x128xf32>
    %c2_258 = arith.constant 2 : index
    %c3_259 = arith.constant 3 : index
    %555 = vector.load %arg5[%c2_258, %c3_259] : memref<4x8xf32, #tpu.memory_space<vmem>>, vector<1x1xf32>
    %556 = vector.broadcast %555 : vector<1x1xf32> to vector<1x128xf32>
    %557 = arith.mulf %556, %264 : vector<1x128xf32>
    %558 = arith.addf %554, %557 : vector<1x128xf32>
    %559 = vector.shape_cast %558 : vector<1x128xf32> to vector<1x128xf32>
    %560 = vector.broadcast %559 : vector<1x128xf32> to vector<8x128xf32>
    %561 = arith.mulf %560, %256 : vector<8x128xf32>
    %c2_260 = arith.constant 2 : index
    %c4_261 = arith.constant 4 : index
    %562 = vector.load %arg5[%c2_260, %c4_261] : memref<4x8xf32, #tpu.memory_space<vmem>>, vector<1x1xf32>
    %563 = vector.broadcast %562 : vector<1x1xf32> to vector<8x128xf32>
    %564 = arith.mulf %563, %442 : vector<8x128xf32>
    %565 = arith.addf %561, %564 : vector<8x128xf32>
    %c2_262 = arith.constant 2 : index
    %c5_263 = arith.constant 5 : index
    %566 = vector.load %arg5[%c2_262, %c5_263] : memref<4x8xf32, #tpu.memory_space<vmem>>, vector<1x1xf32>
    %567 = vector.broadcast %566 : vector<1x1xf32> to vector<8x128xf32>
    %568 = arith.mulf %567, %449 : vector<8x128xf32>
    %569 = arith.addf %565, %568 : vector<8x128xf32>
    %c2_264 = arith.constant 2 : index
    %c6_265 = arith.constant 6 : index
    %570 = vector.load %arg5[%c2_264, %c6_265] : memref<4x8xf32, #tpu.memory_space<vmem>>, vector<1x1xf32>
    %571 = vector.broadcast %570 : vector<1x1xf32> to vector<8x128xf32>
    %572 = arith.mulf %571, %456 : vector<8x128xf32>
    %573 = arith.addf %569, %572 : vector<8x128xf32>
    %c2_266 = arith.constant 2 : index
    %c7_267 = arith.constant 7 : index
    %574 = vector.load %arg5[%c2_266, %c7_267] : memref<4x8xf32, #tpu.memory_space<vmem>>, vector<1x1xf32>
    %575 = vector.broadcast %574 : vector<1x1xf32> to vector<8x128xf32>
    %576 = arith.mulf %575, %463 : vector<8x128xf32>
    %577 = arith.addf %573, %576 : vector<8x128xf32>
    %cst_268 = arith.constant dense<0xFF800000> : vector<128xf32>
    %578 = vector.multi_reduction <maximumf>, %577, %cst_268 [0] : vector<8x128xf32> to vector<128xf32>
    %579 = vector.shape_cast %578 : vector<128xf32> to vector<1x128xf32>
    %c2_269 = arith.constant 2 : index
    %c0_270 = arith.constant 0 : index
    %580 = vector.load %arg6[%c2_269, %c0_270] : memref<4x1xf32, #tpu.memory_space<vmem>>, vector<1x1xf32>
    %581 = vector.broadcast %580 : vector<1x1xf32> to vector<1x128xf32>
    %582 = arith.addf %579, %581 : vector<1x128xf32>
    %c2_271 = arith.constant 2 : index
    %c0_272 = arith.constant 0 : index
    %583 = vector.load %arg7[%c2_271, %c0_272] : memref<4x128xf32, #tpu.memory_space<vmem>>, vector<1x128xf32>
    tpu.vector_store %arg7[%c2_271, %c0_272], %582 {strides = array<i32>} : memref<4x128xf32, #tpu.memory_space<vmem>>, vector<1x128xf32>,
    %c3_273 = arith.constant 3 : index
    %c0_274 = arith.constant 0 : index
    %584 = vector.load %arg5[%c3_273, %c0_274] : memref<4x8xf32, #tpu.memory_space<vmem>>, vector<1x1xf32>
    %585 = vector.broadcast %584 : vector<1x1xf32> to vector<1x128xf32>
    %586 = arith.mulf %585, %258 : vector<1x128xf32>
    %c3_275 = arith.constant 3 : index
    %c1_276 = arith.constant 1 : index
    %587 = vector.load %arg5[%c3_275, %c1_276] : memref<4x8xf32, #tpu.memory_space<vmem>>, vector<1x1xf32>
    %588 = vector.broadcast %587 : vector<1x1xf32> to vector<1x128xf32>
    %589 = arith.mulf %588, %260 : vector<1x128xf32>
    %590 = arith.addf %586, %589 : vector<1x128xf32>
    %c3_277 = arith.constant 3 : index
    %c2_278 = arith.constant 2 : index
    %591 = vector.load %arg5[%c3_277, %c2_278] : memref<4x8xf32, #tpu.memory_space<vmem>>, vector<1x1xf32>
    %592 = vector.broadcast %591 : vector<1x1xf32> to vector<1x128xf32>
    %593 = arith.mulf %592, %262 : vector<1x128xf32>
    %594 = arith.addf %590, %593 : vector<1x128xf32>
    %c3_279 = arith.constant 3 : index
    %c3_280 = arith.constant 3 : index
    %595 = vector.load %arg5[%c3_279, %c3_280] : memref<4x8xf32, #tpu.memory_space<vmem>>, vector<1x1xf32>
    %596 = vector.broadcast %595 : vector<1x1xf32> to vector<1x128xf32>
    %597 = arith.mulf %596, %264 : vector<1x128xf32>
    %598 = arith.addf %594, %597 : vector<1x128xf32>
    %599 = vector.shape_cast %598 : vector<1x128xf32> to vector<1x128xf32>
    %600 = vector.broadcast %599 : vector<1x128xf32> to vector<8x128xf32>
    %601 = arith.mulf %600, %256 : vector<8x128xf32>
    %c3_281 = arith.constant 3 : index
    %c4_282 = arith.constant 4 : index
    %602 = vector.load %arg5[%c3_281, %c4_282] : memref<4x8xf32, #tpu.memory_space<vmem>>, vector<1x1xf32>
    %603 = vector.broadcast %602 : vector<1x1xf32> to vector<8x128xf32>
    %604 = arith.mulf %603, %442 : vector<8x128xf32>
    %605 = arith.addf %601, %604 : vector<8x128xf32>
    %c3_283 = arith.constant 3 : index
    %c5_284 = arith.constant 5 : index
    %606 = vector.load %arg5[%c3_283, %c5_284] : memref<4x8xf32, #tpu.memory_space<vmem>>, vector<1x1xf32>
    %607 = vector.broadcast %606 : vector<1x1xf32> to vector<8x128xf32>
    %608 = arith.mulf %607, %449 : vector<8x128xf32>
    %609 = arith.addf %605, %608 : vector<8x128xf32>
    %c3_285 = arith.constant 3 : index
    %c6_286 = arith.constant 6 : index
    %610 = vector.load %arg5[%c3_285, %c6_286] : memref<4x8xf32, #tpu.memory_space<vmem>>, vector<1x1xf32>
    %611 = vector.broadcast %610 : vector<1x1xf32> to vector<8x128xf32>
    %612 = arith.mulf %611, %456 : vector<8x128xf32>
    %613 = arith.addf %609, %612 : vector<8x128xf32>
    %c3_287 = arith.constant 3 : index
    %c7_288 = arith.constant 7 : index
    %614 = vector.load %arg5[%c3_287, %c7_288] : memref<4x8xf32, #tpu.memory_space<vmem>>, vector<1x1xf32>
    %615 = vector.broadcast %614 : vector<1x1xf32> to vector<8x128xf32>
    %616 = arith.mulf %615, %463 : vector<8x128xf32>
    %617 = arith.addf %613, %616 : vector<8x128xf32>
    %cst_289 = arith.constant dense<0xFF800000> : vector<128xf32>
    %618 = vector.multi_reduction <maximumf>, %617, %cst_289 [0] : vector<8x128xf32> to vector<128xf32>
    %619 = vector.shape_cast %618 : vector<128xf32> to vector<1x128xf32>
    %c3_290 = arith.constant 3 : index
    %c0_291 = arith.constant 0 : index
    %620 = vector.load %arg6[%c3_290, %c0_291] : memref<4x1xf32, #tpu.memory_space<vmem>>, vector<1x1xf32>
    %621 = vector.broadcast %620 : vector<1x1xf32> to vector<1x128xf32>
    %622 = arith.addf %619, %621 : vector<1x128xf32>
    %c3_292 = arith.constant 3 : index
    %c0_293 = arith.constant 0 : index
    %623 = vector.load %arg7[%c3_292, %c0_293] : memref<4x128xf32, #tpu.memory_space<vmem>>, vector<1x128xf32>
    tpu.vector_store %arg7[%c3_292, %c0_293], %622 {strides = array<i32>} : memref<4x128xf32, #tpu.memory_space<vmem>>, vector<1x128xf32>,
    return
  }
  func.func @transform_0(%arg0: i32) -> (i32, i32, i32) {
    %c0_i32 = arith.constant 0 : i32
    %c0_i32_0 = arith.constant 0 : i32
    %c0_i32_1 = arith.constant 0 : i32
    return %c0_i32, %c0_i32_0, %arg0 : i32, i32, i32
  }
  func.func @transform_1(%arg0: i32) -> (i32, i32, i32) {
    %c0_i32 = arith.constant 0 : i32
    %c0_i32_0 = arith.constant 0 : i32
    %c0_i32_1 = arith.constant 0 : i32
    return %c0_i32, %c0_i32_0, %arg0 : i32, i32, i32
  }
  func.func @transform_2(%arg0: i32) -> (i32, i32, i32) {
    %c0_i32 = arith.constant 0 : i32
    %c0_i32_0 = arith.constant 0 : i32
    %c0_i32_1 = arith.constant 0 : i32
    %c0_i32_2 = arith.constant 0 : i32
    return %c0_i32, %c0_i32_0, %c0_i32_1 : i32, i32, i32
  }
  func.func @transform_3(%arg0: i32) -> (i32, i32, i32) {
    %c0_i32 = arith.constant 0 : i32
    %c0_i32_0 = arith.constant 0 : i32
    %c0_i32_1 = arith.constant 0 : i32
    %c0_i32_2 = arith.constant 0 : i32
    return %c0_i32, %c0_i32_0, %c0_i32_1 : i32, i32, i32
  }
  func.func @transform_4(%arg0: i32) -> (i32, i32) {
    %c0_i32 = arith.constant 0 : i32
    %c0_i32_0 = arith.constant 0 : i32
    %c0_i32_1 = arith.constant 0 : i32
    return %c0_i32, %c0_i32_0 : i32, i32
  }
  func.func @transform_5(%arg0: i32) -> (i32, i32) {
    %c0_i32 = arith.constant 0 : i32
    %c0_i32_0 = arith.constant 0 : i32
    %c0_i32_1 = arith.constant 0 : i32
    return %c0_i32, %c0_i32_0 : i32, i32
  }
  func.func @transform_6(%arg0: i32) -> (i32, i32) {
    %c0_i32 = arith.constant 0 : i32
    %c0_i32_0 = arith.constant 0 : i32
    return %c0_i32, %arg0 : i32, i32
  }
}

</mosaic_0001>

<bundles_post_ra>
// kernel: tpu_custom_call.1
= control target key start
LH: loop header
LB: loop body
LE: loop exit
PB: predicated region body
PF: predicated region fallthrough
CT: control target
= control target key end

     0   :  { %11 = vsyncpa [#allocation3], 0  ;;  %s2167_s0 = inlined_call_operand.hbm [shape: f32[3,8,256], index: 0, kind: input, shape index: {}]   ;;  %s2168_s1 = inlined_call_operand.vmem [shape: f32[4,8,256], index: 1, kind: input, shape index: {}]   ;;  %s2169_s2 = inlined_call_operand.vmem [shape: f32[3,8,1], index: 2, kind: input, shape index: {}]   ;;  %s2170_s3 = inlined_call_operand.vmem [shape: f32[8,8,1], index: 3, kind: input, shape index: {}]   ;;  %s2171_s4 = inlined_call_operand.vmem [shape: f32[4,8], index: 4, kind: input, shape index: {}]   ;;  %s2172_s5 = inlined_call_operand.vmem [shape: f32[4,1], index: 5, kind: input, shape index: {}]   ;;  %s2173_s6 = inlined_call_operand.hbm [shape: f32[4,256], index: 6, kind: output, shape index: {}]  }
   0x1   :  { %13 = vsyncpa [#allocation3 + $0x1], 0 }
   0x2   :  { %14 = vsyncpa [#allocation4], 0 }
   0x3   :  { %16 = vsyncpa [#allocation4 + $0x1], 0  ;;  %s1554_s21 = smov 0   ;;  %s1556_s22 = smov 0  }
   0x4   :  { %s1558_s23 = smov 0   ;;  %s1560_s24 = smov 0  }
   0x5 LB: > { %s1575_s25 = sadd.s32 4294967295, %s1504_s24   ;;  %s1249_s26 = sadd.s32 4294967294, %s1504_s24   ;;  %s1504_s24 = sphi %s1560_s24, %s2186_s24   ;;  %s1500_s23 = sphi %s1558_s23, %s2185_s23   ;;  %s1496_s22 = sphi %s1556_s22, %s2184_s22   ;;  %s1492_s21 = sphi %s1554_s21, %s2183_s21  }
   0x6   : > { %s1579_s27 = sadd.s32 1, %s1504_s24   ;;  %s29_s28 = sadd.s32 1, %s1500_s23 }
   0x7   : > { %s26_s29 = ssub.s32 %s1504_s24, %s1579_s27  ;;  %p36_p0 = scmp.ne.s32.totalorder %s1500_s23, %s1496_s22 }
   0x8   : > { %p27_p1 = scmp.eq.s32.totalorder %s26_s29, 0  ;;  %p37_p2 = scmp.eq.s32.totalorder %s1504_s24, 0 }
   0x9   : > { %p42_p3 = scmp.ne.s32.totalorder %s1496_s22, %s1492_s21  ;;  %p43_p4 = scmp.eq.s32.totalorder %s1575_s25, 0 }
   0xa   : > { %s1591_s30 = scalar_select %p27_p1, %s1500_s23, %s29_s28  }
   0xb   : > { %p1593_p5 = por %p37_p2, %p36_p0  ;;  %p1597_p6 = por %p43_p4, %p42_p3 }
   0xc   : > { %p176_p7 = scmp.eq.s32.totalorder %s1575_s25, 1  ;;  %p182_p8 = scmp.eq.s32.totalorder %s1249_s26, 1 }
   0xd   : > { %p2174_p11 = scmp.ge.s32.totalorder %s1504_s24, 2 }
   0xe   : > { %p1602_p9 = por %p176_p7, %p36_p0  ;;  %p1606_p10 = por %p182_p8, %p42_p3 }
   0xf   : > { %210 = sbr.rel (%p2174_p11) target bundleno = 50 (0x32), region = 32  ;;  %s1614_s11 = sand.u32 (!%p2174_p11), 1, %s1500_s23  }
  0x10   : > { %s2178_s9 = scalar_select %p1602_p9, 1, 0 }
  0x11   : > { %s2179_s10 = scalar_select %p1606_p10, 1, 0 }
  0x12   : > { %s1252_s12 = sshll.u32 (!%p2174_p11), %s1504_s24, 7  ;;  %s1311_s13 = smul.u32 (!%p2174_p11), 24, %s1614_s11 }
  0x13   : > { %s1621_s16 = scalar_lea.hbm (!%p2174_p11), %s2167_s0, %s1252_s12  ;;  %s215_s19 = scalar_lea.sflag (!%p2174_p11), [#allocation3], %s1614_s11 }
  0x14   : > { %s218_s17 = scalar_lea.vmem (!%p2174_p11), [#allocation2], %s1311_s13  ;;  %s1410_s20 = scalar_lea.hbm (!%p2174_p11), %s1621_s16, 384 }
  0x15   : > { %s224_s18 = sshll.u32 (!%p2174_p11), %s218_s17, 4  ;;  %p1411_p12 = scmp.ne.s32.totalorder (!%p2174_p11), %s1621_s16, %s1410_s20  ;;  %s1623_s18 = int_to_ptr.vmem [resolvable:$true] %s224_s18 }
  0x16   : > { %s1414_s29 = scalar_lea.hbm %s2167_s0, 768  ;;  %p1415_p1 = scmp.lt.u32.totalorder %s1621_s16, %s2167_s0 }
  0x17   : > { %p1412_p13 = pnand %p1411_p12, %p1593_p5  ;;  %p1416_p2 = scmp.lt.u32.totalorder %s1414_s29, %s1410_s20 }
  0x18   : > { %p1418_p4 = scmp.lt.u32.totalorder %s1410_s20, %s1621_s16 }
  0x19   : > { %p1413_p0 = pneg %p1412_p13  ;;  %p1417_p3 = por %p1416_p2, %p1415_p1 }
  0x1b   : > { %p1419_p7 = por %p1418_p4, %p1417_p3 }
  0x1d   : > { %p1420_p8 = pnand %p1419_p7, %p1413_p0 }
  0x1f   : > { %1423 = shalt.err (!%p1420_p8)
}
  0x20   : > { %s1424_s13 = scalar_lea.vmem %s1623_s18, 384  ;;  %s1506_s15 = smov [#allocation2]  }
  0x21   : > { %p1425_p12 = scmp.ne.s32.totalorder %s1623_s18, %s1424_s13  ;;  %s1428_s17 = sshll.u32 %s1506_s15, 4  ;;  %s1429_s17 = int_to_ptr.vmem [resolvable:$false] %s1428_s17 }
  0x22   : > { %s1430_s26 = scalar_lea.vmem %s1429_s17, 768  ;;  %p1431_p10 = scmp.lt.s32.totalorder %s1623_s18, %s1429_s17 }
  0x23   : > { %p1426_p13 = pnand %p1425_p12, %p1593_p5  ;;  %p1432_p9 = scmp.lt.s32.totalorder %s1430_s26, %s1424_s13 }
  0x25   : > { %p1427_p11 = pneg %p1426_p13  ;;  %p1433_p1 = por %p1432_p9, %p1431_p10 }
  0x27   : > { %p1434_p2 = pnand %p1433_p1, %p1427_p11 }
  0x29   : > { %1437 = shalt.err (!%p1434_p2)
}
  0x2a   : > { %s1507_s20 = smov 256   ;;  %s1508_s28 = smov 128  }
  0x2b   : > { %s1509_s29 = smov 8   ;;  %233 = sbr.rel (!%p1593_p5) target bundleno = 50 (0x32), region = 40 }
  0x2c   : > { %1345 = dma.hbm_to_vmem [thread:$0]  (%p1593_p5), %s1621_s16, 384, %s1623_s18, %s215_s19, %s1507_s20, %s1508_s28, %s1509_s29  }
  0x2d   : > { %s1253_s12 = sshll.u32 (%p1593_p5), %s1614_s11, 5  ;;  %s1254_s14 = sshll.u32 (%p1593_p5), %s1504_s24, 3 }
  0x2e   : > { %s239_s17 = scalar_lea.vmem (%p1593_p5), %s2168_s1, %s1254_s14  ;;  %s237_s26 = scalar_lea.vmem (%p1593_p5), [#allocation5], %s1253_s12 }
  0x2f   : > { %v273_v0 = vld [vmem:[%s239_s17] sm:$0xff] (%p1593_p5)  ;;  %v275_v1 = vld [vmem:[%s239_s17 + $0x10] sm:$0xff] (%p1593_p5) }
  0x30   : > { %v277_v2 = vld [vmem:[%s239_s17 + $0x20] sm:$0xff] (%p1593_p5)  ;;  %274 = vst [vmem:[%s237_s26] sm:$0xff] (%p1593_p5), %v273_v0  ;;  %276 = vst [vmem:[%s237_s26 + $0x8] sm:$0xff] (%p1593_p5), %v275_v1  ;;  %v279_v3 = vld [vmem:[%s239_s17 + $0x30] sm:$0xff] (%p1593_p5) }
  0x31   : > { %278 = vst [vmem:[%s237_s26 + $0x10] sm:$0xff] (%p1593_p5), %v277_v2  ;;  %280 = vst [vmem:[%s237_s26 + $0x18] sm:$0xff] (%p1593_p5), %v279_v3 }
  0x32 PF: > { %p1255_p5 = scmp.ge.s32.totalorder %s1504_s24, 1  ;;  %p285_p9 = scmp.lt.s32.totalorder %s1504_s24, 3 }
  0x34   : > { %p286_p10 = pnand %p1255_p5, %p285_p9 }
  0x35   : > { %s1659_s7 = sand.u32 (!%p286_p10), 1, %s1496_s22  }
  0x36   : > { %289 = sbr.rel (%p286_p10) target bundleno = 332 (0x14c), region = 78  ;;  %s292_s16 = scalar_lea.sflag (!%p286_p10), [#allocation3], %s1659_s7 }
  0x37   : > { %s1312_s11 = smul.u32 (!%p286_p10), 24, %s1659_s7 }
  0x39   : > { %s1663_s18 = scalar_lea.vmem (!%p286_p10), [#allocation2], %s1312_s11 }
  0x3d   : > { %1483 = dma.done.wait (%p1597_p6), %s292_s16, 384  }
  0x3e   : > { %1485 = vsyncadd (%p1597_p6), %s292_s16, 4294966912  ;;  %v1510_v4 = vmov 0   ;;  %v1262_v5 = vld [vmem:[%s2170_s3 + $0x8] sm:$0xff]  ;;  %v335_v6 = vld [vmem:[%s2169_s2] sm:$0xff]  ;;  %s1511_s11 = smov 124   ;;  %s1512_s16 = smov 122   ;;  %v375_v27 = vlaneseq }
  0x3f   : > { %1398 = vset.pattern.permute.xlu1 %v1510_v4  ;;  %1397 = vset.pattern.permute.xlu0 %v1510_v4  ;;  %v1259_v7 = vld [vmem:[%s2169_s2 + $0x10] sm:$0xff]  ;;  %v1258_v8 = vld [vmem:[%s2169_s2 + $0x8] sm:$0xff]  ;;  %v1268_v9 = vld [vmem:[%s2170_s3 + $0x18] sm:$0xff]  ;;  %s1513_s19 = smov 123   ;;  %s1514_s29 = smov 121   ;;  %v1515_v20 = vmov 1  }
  0x40   : > { %370 = vperm.xlu1 %1398, %v1262_v5   ;;  %338 = vperm.xlu0 %1397, %v335_v6   ;;  %v1265_v10 = vld [vmem:[%s2170_s3 + $0x10] sm:$0xff]  ;;  %v1271_v11 = vld [vmem:[%s2170_s3 + $0x20] sm:$0xff]  ;;  %v1274_v14 = vld [vmem:[%s2170_s3 + $0x28] sm:$0xff]  ;;  %v1516_v21 = vmov 2   ;;  %v1517_v22 = vmov 3   ;;  %v376_v28 = vshrl.u32 %v375_v27, 7 }
  0x41   : > { %v360_v12 = vld [vmem:[%s2170_s3] sm:$0xff]  ;;  %v1277_v13 = vld [vmem:[%s2170_s3 + $0x30] sm:$0xff]  ;;  %v1280_v16 = vld [vmem:[%s2170_s3 + $0x38] sm:$0xff]  ;;  %p2180_p11 = scmp.ne.s32.totalorder %s2178_s9, 0 }
  0x42   : > { %v859_v15 = vld [vmem:[%s2171_s4] sm:$0x1]  ;;  %v931_v17 = vld [vmem:[%s2171_s4 + $0x1] sm:$0x1]  ;;  %v1003_v18 = vld [vmem:[%s2171_s4 + $0x2] sm:$0x1] }
  0x43   : > { %v1075_v19 = vld [vmem:[%s2171_s4 + $0x3] sm:$0x1]  ;;  %v923_v23 = vld [vmem:[%s2172_s5] sm:$0x1]  ;;  %v995_v25 = vld [vmem:[%s2172_s5 + $0x1] sm:$0x1] }
  0x44   : > { %352 = vperm.xlu1 %1398, %v1259_v7   ;;  %345 = vperm.xlu0 %1397, %v1258_v8   ;;  %v1139_v24 = vld [vmem:[%s2172_s5 + $0x3] sm:$0x1]  ;;  %v1067_v26 = vld [vmem:[%s2172_s5 + $0x2] sm:$0x1]  ;;  %v1732_v29 = vld [vmem:[%s1663_s18] sm:$0x1] }
  0x45   : > { %v373_v30 = vld [vmem:[%s1663_s18 + $0x1] sm:$0x1]  ;;  %v1736_v32 = vsub.s32 0, %v376_v28  ;;  %v1739_v33 = vld [vmem:[%s1663_s18 + $0x8] sm:$0x1] }
  0x46   : > { %v374_v31 = vsub.f32 %v373_v30, %v1732_v29  ;;  %v1263_v34 = vld [vmem:[%s1663_s18 + $0x9] sm:$0x1]  ;;  %v435_v35 = vld [vmem:[%s1663_s18 + $0x3] sm:$0x1]  ;;  %v404_v36 = vld [vmem:[%s1663_s18 + $0x2] sm:$0x1] }
  0x47   : > { %v1745_v37 = vld [vmem:[%s1663_s18 + $0x10] sm:$0x1]  ;;  %v1264_v38 = vld [vmem:[%s1663_s18 + $0x11] sm:$0x1]  ;;  %v1269_v39 = vld [vmem:[%s1663_s18 + $0xb] sm:$0x1]  ;;  %v382_v42 = vsub.f32 %v1263_v34, %v1739_v33  ;;  %v436_v43 = vsub.f32 %v435_v35, %v1732_v29  ;;  %v405_v44 = vsub.f32 %v404_v36, %v1732_v29 }
  0x48   : > { %432 = vperm.xlu1 %1398, %v1268_v9   ;;  %401 = vperm.xlu0 %1397, %v1265_v10   ;;  %v1270_v40 = vld [vmem:[%s1663_s18 + $0x13] sm:$0x1]  ;;  %v378_v41 = vrot.slane %v374_v31, %v1736_v32  ;;  %v1266_v45 = vld [vmem:[%s1663_s18 + $0xa] sm:$0x1]  ;;  %v1267_v46 = vld [vmem:[%s1663_s18 + $0x12] sm:$0x1]  ;;  %v390_v47 = vsub.f32 %v1264_v38, %v1745_v37  ;;  %v444_v48 = vsub.f32 %v1269_v39, %v1739_v33 }
  0x49   : > { %v452_v49 = vsub.f32 %v1270_v40, %v1745_v37  ;;  %v466_v50 = vld [vmem:[%s1663_s18 + $0x4] sm:$0x1]  ;;  %v1272_v51 = vld [vmem:[%s1663_s18 + $0xc] sm:$0x1]  ;;  %v413_v54 = vsub.f32 %v1266_v45, %v1739_v33  ;;  %v421_v55 = vsub.f32 %v1267_v46, %v1745_v37  ;;  %v1273_v56 = vld [vmem:[%s1663_s18 + $0x14] sm:$0x1]  ;;  %v386_v59 = vrot.slane %v382_v42, %v1736_v32 }
  0x4a   : > { %v528_v57 = vld [vmem:[%s1663_s18 + $0x6] sm:$0x1]  ;;  %v440_v60 = vrot.slane %v436_v43, %v1736_v32  ;;  %v409_v61 = vrot.slane %v405_v44, %v1736_v32  ;;  %v1278_v62 = vld [vmem:[%s1663_s18 + $0xe] sm:$0x1]  ;;  %v1279_v63 = vld [vmem:[%s1663_s18 + $0x16] sm:$0x1]  ;;  %v394_v0 = vrot.slane %v390_v47, %v1736_v32  ;;  %v467_v1 = vsub.f32 %v466_v50, %v1732_v29 }
  0x4b   : > { %v475_v2 = vsub.f32 %v1272_v51, %v1739_v33  ;;  %v448_v3 = vrot.slane %v444_v48, %v1736_v32  ;;  %v483_v5 = vsub.f32 %v1273_v56, %v1745_v37  ;;  %v529_v6 = vsub.f32 %v528_v57, %v1732_v29  ;;  %v497_v7 = vld [vmem:[%s1663_s18 + $0x5] sm:$0x1]  ;;  %v1275_v8 = vld [vmem:[%s1663_s18 + $0xd] sm:$0x1]  ;;  %v559_v28 = vld [vmem:[%s1663_s18 + $0x7] sm:$0x1] }
  0x4c   : > { %463 = vperm.xlu1 %1398, %v1271_v11   ;;  %363 = vperm.xlu0 %1397, %v360_v12   ;;  %v417_v11 = vrot.slane %v413_v54, %v1736_v32  ;;  %v425_v12 = vrot.slane %v421_v55, %v1736_v32  ;;  %v1281_v43 = vld [vmem:[%s1663_s18 + $0xf] sm:$0x1]  ;;  %v560_v47 = vsub.f32 %v559_v28, %v1732_v29 }
  0x4d   : > { %v533_v27 = vrot.slane %v529_v6, %v1736_v32 }
  0x50   : > { %525 = vperm.xlu1 %1398, %v1277_v13   ;;  %494 = vperm.xlu0 %1397, %v1274_v14   ;;  %v537_v13 = vsub.f32 %v1278_v62, %v1739_v33  ;;  %v545_v14 = vsub.f32 %v1279_v63, %v1745_v37 }
  0x52   : > { %v541_v35 = vrot.slane %v537_v13, %v1736_v32  ;;  %v549_v36 = vrot.slane %v545_v14, %v1736_v32 }
  0x54   : > { %889 = vrot.lane.b32.xlu1 %v859_v15, %s1511_s11  ;;  %556 = vperm.xlu0 %1397, %v1280_v16  }
  0x58   : > { %903 = vrot.lane.b32.xlu1 %v859_v15, %s1512_s16  ;;  %896 = vrot.lane.b32.xlu0 %v859_v15, %s1513_s19 }
  0x5c   : > { %961 = vrot.lane.b32.xlu1 %v931_v17, %s1511_s11  ;;  %910 = vrot.lane.b32.xlu0 %v859_v15, %s1514_s29 }
  0x60   : > { %975 = vrot.lane.b32.xlu1 %v931_v17, %s1512_s16  ;;  %968 = vrot.lane.b32.xlu0 %v931_v17, %s1513_s19 }
  0x64   : > { %1033 = vrot.lane.b32.xlu1 %v1003_v18, %s1511_s11  ;;  %982 = vrot.lane.b32.xlu0 %v931_v17, %s1514_s29 }
  0x68   : > { %1047 = vrot.lane.b32.xlu1 %v1003_v18, %s1512_s16  ;;  %1040 = vrot.lane.b32.xlu0 %v1003_v18, %s1513_s19 }
  0x6c   : > { %1105 = vrot.lane.b32.xlu1 %v1075_v19, %s1511_s11  ;;  %1054 = vrot.lane.b32.xlu0 %v1003_v18, %s1514_s29 }
  0x70   : > { %1119 = vrot.lane.b32.xlu1 %v1075_v19, %s1512_s16  ;;  %1112 = vrot.lane.b32.xlu0 %v1075_v19, %s1513_s19 }
  0x74   : > { %862 = vperm.xlu1 %1398, %v859_v15   ;;  %1126 = vrot.lane.b32.xlu0 %v1075_v19, %s1514_s29 }
  0x78   : > { %934 = vperm.xlu1 %1398, %v931_v17   ;;  %1006 = vperm.xlu0 %1397, %v1003_v18  }
  0x7c   : > { %1399 = vset.pattern.permute.xlu1 %v1515_v20  ;;  %1400 = vset.pattern.permute.xlu0 %v1515_v20  ;;  %v471_v20 = vrot.slane %v467_v1, %v1736_v32  ;;  %v564_v1 = vrot.slane %v560_v47, %v1736_v32 }
  0x7d   : > { %939 = vperm.xlu1 %1399, %v931_v17   ;;  %867 = vperm.xlu0 %1400, %v859_v15  }
  0x81   : > { %1011 = vperm.xlu1 %1399, %v1003_v18   ;;  %1083 = vperm.xlu0 %1400, %v1075_v19  }
  0x85   : > { %1401 = vset.pattern.permute.xlu1 %v1510_v4  ;;  %1403 = vset.pattern.permute.xlu0 %v1516_v21 }
  0x86   : > { %1078 = vperm.xlu1 %1401, %v1075_v19   ;;  %1017 = vperm.xlu0 %1403, %v1003_v18  }
  0x8a   : > { %1402 = vset.pattern.permute.xlu1 %v1516_v21  ;;  %1405 = vset.pattern.permute.xlu0 %v1517_v22  ;;  %v479_v21 = vrot.slane %v475_v2, %v1736_v32 }
  0x8b   : > { %873 = vperm.xlu1 %1402, %v859_v15   ;;  %951 = vperm.xlu0 %1405, %v931_v17  }
  0x8f   : > { %945 = vperm.xlu1 %1402, %v931_v17   ;;  %1406 = vset.pattern.permute.xlu0 %v1510_v4 }
  0x90   : > { %926 = vperm.xlu0 %1406, %v923_v23   ;;  %v506_v23 = vsub.f32 %v1275_v8, %v1739_v33 }
  0x92   : > { %v510_v46 = vrot.slane %v506_v23, %v1736_v32 }
  0x93   : > { %1089 = vperm.xlu1 %1402, %v1075_v19  }
  0x94   : > { %1142 = vperm.xlu0 %1406, %v1139_v24  }
  0x97   : > { %1404 = vset.pattern.permute.xlu1 %v1517_v22  ;;  %v498_v22 = vsub.f32 %v497_v7, %v1732_v29 }
  0x98   : > { %879 = vperm.xlu1 %1404, %v859_v15  }
  0x99   : > { %v502_v45 = vrot.slane %v498_v22, %v1736_v32 }
  0x9c   : > { %1023 = vperm.xlu1 %1404, %v1003_v18  }
  0xa0   : > { %1095 = vperm.xlu1 %1404, %v1075_v19   ;;  %v1276_v19 = vld [vmem:[%s1663_s18 + $0x15] sm:$0x1] }
  0xa1   : > { %v514_v38 = vsub.f32 %v1276_v19, %v1745_v37 }
  0xa4   : > { %1407 = vset.pattern.permute.xlu1 %v1510_v4  ;;  %v456_v4 = vrot.slane %v452_v49, %v1736_v32 }
  0xa5   : > { %998 = vperm.xlu1 %1407, %v995_v25  }
  0xa9   : > { %1070 = vperm.xlu1 %1407, %v1067_v26   ;;  %v487_v26 = vrot.slane %v483_v5, %v1736_v32 }
  0xbf   : > { %v371_v52 = vpop.permute.xlu1 %370  ;;  %v1761_v53 = vpop.permute.xlu0 %338 }
  0xc0   : > { %v379_v58 = vmul.f32 %v378_v41, %v1761_v53  ;;  %v441_v17 = vmul.f32 %v440_v60, %v1761_v53  ;;  %v410_v18 = vmul.f32 %v409_v61, %v1761_v53  ;;  %v472_v44 = vmul.f32 %v471_v20, %v1761_v53 }
  0xc1   : > { %v534_v63 = vmul.f32 %v533_v27, %v1761_v53  ;;  %v565_v19 = vmul.f32 %v564_v1, %v1761_v53 }
  0xc2   : > { %v380_v15 = vadd.f32 %v379_v58, %v371_v52  ;;  %v1282_v52 = vld [vmem:[%s1663_s18 + $0x17] sm:$0x1]  ;;  %v518_v58 = vrot.slane %v514_v38, %v1736_v32  ;;  %s1256_s18 = sshll.u32 %s1659_s7, 5 }
  0xc3   : > { %v1782_v9 = vpop.permute.xlu1 %352  ;;  %v1784_v10 = vpop.permute.xlu0 %345  ;;  %v576_v2 = vsub.f32 %v1282_v52, %v1745_v37  ;;  %s1862_s29 = scalar_lea.vmem [#allocation5], %s1256_s18 }
  0xc4   : > { %v387_v16 = vmul.f32 %v386_v59, %v1784_v10  ;;  %v395_v24 = vmul.f32 %v394_v0, %v1782_v9  ;;  %v449_v31 = vmul.f32 %v448_v3, %v1784_v10  ;;  %v418_v41 = vmul.f32 %v417_v11, %v1784_v10 }
  0xc5   : > { %v457_v48 = vmul.f32 %v456_v4, %v1782_v9  ;;  %v426_v50 = vmul.f32 %v425_v12, %v1782_v9  ;;  %v480_v55 = vmul.f32 %v479_v21, %v1784_v10  ;;  %v568_v59 = vsub.f32 %v1281_v43, %v1739_v33 }
  0xc6   : > { %v388_v25 = vadd.f32 %v387_v16, %v380_v15  ;;  %v503_v0 = vmul.f32 %v502_v45, %v1761_v53  ;;  %v488_v4 = vmul.f32 %v487_v26, %v1782_v9  ;;  %v542_v8 = vmul.f32 %v541_v35, %v1784_v10 }
  0xc7   : > { %v433_v30 = vpop.permute.xlu1 %432  ;;  %v402_v34 = vpop.permute.xlu0 %401  ;;  %v511_v11 = vmul.f32 %v510_v46, %v1784_v10  ;;  %v572_v13 = vrot.slane %v568_v59, %v1736_v32  ;;  %v550_v37 = vmul.f32 %v549_v36, %v1782_v9  ;;  %v580_v20 = vrot.slane %v576_v2, %v1736_v32 }
  0xc8   : > { %v396_v39 = vadd.f32 %v395_v24, %v388_v25  ;;  %v442_v40 = vadd.f32 %v441_v17, %v433_v30  ;;  %v411_v42 = vadd.f32 %v410_v18, %v402_v34  ;;  %v519_v18 = vmul.f32 %v518_v58, %v1782_v9 }
  0xc9   : > { %v573_v30 = vmul.f32 %v572_v13, %v1784_v10  ;;  %v581_v36 = vmul.f32 %v580_v20, %v1782_v9  ;;  %v827_v20 = vld [vmem:[%s1862_s29 + $0x7] sm:$0x1] }
  0xca   : > { %v450_v49 = vadd.f32 %v449_v31, %v442_v40  ;;  %v419_v51 = vadd.f32 %v418_v41, %v411_v42  ;;  %v1816_v56 = vmax.f32 %v396_v39, 0.0 }
  0xcb   : > { %v464_v54 = vpop.permute.xlu1 %463  ;;  %v364_v57 = vpop.permute.xlu0 %363 }
  0xcc   : > { %v458_v60 = vadd.f32 %v457_v48, %v450_v49  ;;  %v427_v61 = vadd.f32 %v426_v50, %v419_v51  ;;  %v473_v29 = vadd.f32 %v472_v44, %v464_v54  ;;  %v583_v62 = vmax.f32 %v364_v57, 0.0 }
  0xce   : > { %v585_v3 = vmax.f32 %v427_v61, 0.0  ;;  %v481_v5 = vadd.f32 %v480_v55, %v473_v29  ;;  %v591_v6 = vmax.f32 %v583_v62, %v1816_v56  ;;  %v586_v7 = vmax.f32 %v458_v60, 0.0 }
  0xcf   : > { %v526_v33 = vpop.permute.xlu1 %525  ;;  %v495_v12 = vpop.permute.xlu0 %494 }
  0xd0   : > { %v489_v14 = vadd.f32 %v488_v4, %v481_v5  ;;  %v592_v15 = vmax.f32 %v591_v6, %v585_v3  ;;  %v535_v16 = vadd.f32 %v534_v63, %v526_v33  ;;  %v504_v17 = vadd.f32 %v503_v0, %v495_v12 }
  0xd2   : > { %v587_v21 = vmax.f32 %v489_v14, 0.0  ;;  %v593_v22 = vmax.f32 %v592_v15, %v586_v7  ;;  %v543_v23 = vadd.f32 %v542_v8, %v535_v16  ;;  %v512_v24 = vadd.f32 %v511_v11, %v504_v17  ;;  %v633_v8 = vld [vmem:[%s1862_s29 + $0x1] sm:$0x1]  ;;  %v1866_v11 = vld [vmem:[%s1862_s29] sm:$0x1] }
  0xd3   : > { %v890_v25 = vpop.permute.xlu1 %889  ;;  %v557_v26 = vpop.permute.xlu0 %556  ;;  %v1871_v14 = vld [vmem:[%s1862_s29 + $0x8] sm:$0x1]  ;;  %v662_v15 = vld [vmem:[%s1862_s29 + $0x2] sm:$0x1]  ;;  %v695_v16 = vld [vmem:[%s1862_s29 + $0x3] sm:$0x1] }
  0xd4   : > { %v551_v27 = vadd.f32 %v550_v37, %v543_v23  ;;  %v520_v28 = vadd.f32 %v519_v18, %v512_v24  ;;  %v566_v31 = vadd.f32 %v565_v19, %v557_v26  ;;  %1313 = vpush %v890_v25  ;;  %v594_v34 = vmax.f32 %v593_v22, %v587_v21  ;;  %v728_v17 = vld [vmem:[%s1862_s29 + $0x4] sm:$0x1]  ;;  %v761_v37 = vld [vmem:[%s1862_s29 + $0x5] sm:$0x1]  ;;  %v794_v19 = vld [vmem:[%s1862_s29 + $0x6] sm:$0x1] }
  0xd5   : > { %v634_v18 = vsub.f32 %v633_v8, %v1866_v11  ;;  %v663_v22 = vsub.f32 %v662_v15, %v1866_v11  ;;  %v1289_v23 = vld [vmem:[%s1862_s29 + $0xa] sm:$0x1]  ;;  %v1292_v24 = vld [vmem:[%s1862_s29 + $0xb] sm:$0x1]  ;;  %v696_v26 = vsub.f32 %v695_v16, %v1866_v11  ;;  %v1305_v8 = vld [vmem:[%s1862_s29 + $0x17] sm:$0x1] }
  0xd6   : > { %v588_v35 = vmax.f32 %v520_v28, 0.0  ;;  %v574_v38 = vadd.f32 %v573_v30, %v566_v31  ;;  %v589_v40 = vmax.f32 %v551_v27, 0.0  ;;  %v729_v27 = vsub.f32 %v728_v17, %v1866_v11  ;;  %v1295_v28 = vld [vmem:[%s1862_s29 + $0xc] sm:$0x1]  ;;  %v1298_v30 = vld [vmem:[%s1862_s29 + $0xd] sm:$0x1] }
  0xd7   : > { %v904_v53 = vpop.permute.xlu1 %903  ;;  %v897_v39 = vpop.permute.xlu0 %896  ;;  %v1301_v31 = vld [vmem:[%s1862_s29 + $0xe] sm:$0x1] }
  0xd8   : > { %v595_v41 = vmax.f32 %v594_v34, %v588_v35  ;;  %v582_v42 = vadd.f32 %v581_v36, %v574_v38  ;;  %1315 = vpush %v897_v39  ;;  %v795_v36 = vsub.f32 %v794_v19, %v1866_v11  ;;  %v828_v38 = vsub.f32 %v827_v20, %v1866_v11  ;;  %v1948_v19 = vld [vmem:[%s1862_s29 + $0x18] sm:$0x1]  ;;  %v1288_v20 = vld [vmem:[%s1862_s29 + $0x19] sm:$0x1] }
  0xd9   : > { %1317 = vpush %v904_v53  ;;  %v1897_v53 = vld [vmem:[%s1862_s29 + $0x10] sm:$0x1] }
  0xda   : > { %v596_v43 = vmax.f32 %v595_v41, %v589_v40  ;;  %v590_v44 = vmax.f32 %v582_v42, 0.0  ;;  %v1287_v41 = vld [vmem:[%s1862_s29 + $0x11] sm:$0x1]  ;;  %v638_v42 = vrot.slane %v634_v18, %v1736_v32 }
  0xdb   : > { %v962_v45 = vpop.permute.xlu1 %961  ;;  %v911_v46 = vpop.permute.xlu0 %910 }
  0xdc   : > { %v597_v47 = vmax.f32 %v596_v43, %v590_v44  ;;  %1319 = vpush %v911_v46  ;;  %v671_v43 = vsub.f32 %v1289_v23, %v1871_v14  ;;  %v737_v46 = vsub.f32 %v1295_v28, %v1871_v14 }
  0xdd   : > { %1321 = vpush %v962_v45  ;;  %v667_v45 = vrot.slane %v663_v22, %v1736_v32 }
  0xde   : > { %v598_v10 = vmul.f32 0.1, %v597_v47  ;;  %v770_v47 = vsub.f32 %v1298_v30, %v1871_v14  ;;  %v741_v16 = vrot.slane %v737_v46, %v1736_v32 }
  0xdf   : > { %v976_v48 = vpop.permute.xlu1 %975  ;;  %v969_v49 = vpop.permute.xlu0 %968 }
  0xe0   : > { %vm599_vm0 = vcmp.gt.f32.partialorder %v583_v62, %v598_v10  ;;  %vm601_vm1 = vcmp.gt.f32.partialorder %v1816_v56, %v598_v10  ;;  %1323 = vpush %v969_v49  ;;  %vm603_vm2 = vcmp.gt.f32.partialorder %v585_v3, %v598_v10  ;;  %vm605_vm3 = vcmp.gt.f32.partialorder %v586_v7, %v598_v10  ;;  %v1293_v49 = vld [vmem:[%s1862_s29 + $0x13] sm:$0x1] }
  0xe1   : > { %v600_v9 = vsel %vm599_vm0, %v583_v62, 0.0  ;;  %v1837_v50 = vsel %vm601_vm1, %v1816_v56, 0.0  ;;  %1325 = vpush %v976_v48  ;;  %v1840_v55 = vsel %vm603_vm2, %v585_v3, 0.0  ;;  %vm607_vm4 = vcmp.gt.f32.partialorder %v587_v21, %v598_v10  ;;  %v1290_v48 = vld [vmem:[%s1862_s29 + $0x12] sm:$0x1] }
  0xe2   : > { %v615_v54 = vadd.f32 %v1837_v50, %v600_v9  ;;  %v1843_v58 = vsel %vm605_vm3, %v586_v7, 0.0  ;;  %vm609_vm5 = vcmp.gt.f32.partialorder %v588_v35, %v598_v10  ;;  %v1846_v61 = vsel %vm607_vm4, %v587_v21, 0.0  ;;  %v1286_v21 = vld [vmem:[%s1862_s29 + $0x9] sm:$0x1] }
  0xe3   : > { %v1034_v51 = vpop.permute.xlu1 %1033  ;;  %v983_v52 = vpop.permute.xlu0 %982  ;;  %vm611_vm6 = vcmp.gt.f32.partialorder %v589_v40, %v598_v10  ;;  %v1849_v62 = vsel %vm609_vm5, %v588_v35, 0.0  ;;  %vm613_vm7 = vcmp.gt.f32.partialorder %v590_v44, %v598_v10  ;;  %v762_v35 = vsub.f32 %v761_v37, %v1866_v11 }
  0xe4   : > { %1327 = vpush %v983_v52  ;;  %v616_v57 = vadd.f32 %v615_v54, %v1840_v55  ;;  %v1852_v2 = vsel %vm611_vm6, %v589_v40, 0.0  ;;  %v1856_v4 = vsel %vm613_vm7, %v590_v44, 0.0  ;;  %v641_v39 = vsub.f32 %v1286_v21, %v1871_v14  ;;  %v1304_v40 = vld [vmem:[%s1862_s29 + $0xf] sm:$0x1]  ;;  %v1291_v21 = vld [vmem:[%s1862_s29 + $0x1a] sm:$0x1] }
  0xe5   : > { %1329 = vpush %v1034_v51  ;;  %v704_v44 = vsub.f32 %v1292_v24, %v1871_v14  ;;  %v803_v10 = vsub.f32 %v1301_v31, %v1871_v14  ;;  %v700_v9 = vrot.slane %v696_v26, %v1736_v32  ;;  %v733_v51 = vrot.slane %v729_v27, %v1736_v32 }
  0xe6   : > { %v617_v56 = vadd.f32 %v616_v57, %v1843_v58  ;;  %v836_v52 = vsub.f32 %v1304_v40, %v1871_v14  ;;  %v648_v54 = vsub.f32 %v1287_v41, %v1897_v53  ;;  %v1296_v57 = vld [vmem:[%s1862_s29 + $0x14] sm:$0x1]  ;;  %v1941_v17 = vrot.slane %v770_v47, %v1736_v32  ;;  %v1303_v47 = vld [vmem:[%s1862_s29 + $0x1e] sm:$0x1] }
  0xe7   : > { %v1048_v59 = vpop.permute.xlu1 %1047  ;;  %v1041_v60 = vpop.permute.xlu0 %1040  ;;  %v1944_v37 = vrot.slane %v803_v10, %v1736_v32  ;;  %v745_v18 = vsub.f32 %v1296_v57, %v1897_v53 }
  0xe8   : > { %1331 = vpush %v1041_v60  ;;  %v618_v29 = vadd.f32 %v617_v56, %v1846_v61  ;;  %v1919_v60 = vrot.slane %v762_v35, %v1736_v32  ;;  %v1922_v56 = vrot.slane %v795_v36, %v1736_v32  ;;  %v1953_v22 = vrot.slane %v836_v52, %v1736_v32  ;;  %v1294_v36 = vld [vmem:[%s1862_s29 + $0x1b] sm:$0x1] }
  0xe9   : > { %1333 = vpush %v1048_v59  ;;  %v652_v23 = vrot.slane %v648_v54, %v1736_v32  ;;  %v844_v35 = vsub.f32 %v1305_v8, %v1897_v53  ;;  %v749_v46 = vrot.slane %v745_v18, %v1736_v32  ;;  %v1306_v54 = vld [vmem:[%s1862_s29 + $0x1f] sm:$0x1]  ;;  %v819_v18 = vsub.f32 %v1303_v47, %v1948_v19 }
  0xea   : > { %v619_v1 = vadd.f32 %v618_v29, %v1849_v62  ;;  %v1925_v29 = vrot.slane %v828_v38, %v1736_v32  ;;  %v1297_v38 = vld [vmem:[%s1862_s29 + $0x1c] sm:$0x1] }
  0xeb   : > { %v1106_v63 = vpop.permute.xlu1 %1105  ;;  %v1055_v0 = vpop.permute.xlu0 %1054 }
  0xec   : > { %1335 = vpush %v1055_v0  ;;  %v620_v3 = vadd.f32 %v619_v1, %v1852_v2  ;;  %v1299_v0 = vld [vmem:[%s1862_s29 + $0x15] sm:$0x1]  ;;  %v1302_v1 = vld [vmem:[%s1862_s29 + $0x16] sm:$0x1] }
  0xed   : > { %1337 = vpush %v1106_v63  ;;  %v645_v63 = vrot.slane %v641_v39, %v1736_v32  ;;  %v778_v24 = vsub.f32 %v1299_v0, %v1897_v53  ;;  %v811_v26 = vsub.f32 %v1302_v1, %v1897_v53  ;;  %v1300_v39 = vld [vmem:[%s1862_s29 + $0x1d] sm:$0x1] }
  0xee   : > { %v1859_v7 = vadd.f32 %v620_v3, %v1856_v4  ;;  %v675_v3 = vrot.slane %v671_v43, %v1736_v32  ;;  %v655_v43 = vsub.f32 %v1288_v20, %v1948_v19  ;;  %v786_v52 = vsub.f32 %v1300_v39, %v1948_v19 }
  0xef   : > { %v1120_v5 = vpop.permute.xlu1 %1119  ;;  %v1113_v6 = vpop.permute.xlu0 %1112  ;;  %v782_v10 = vrot.slane %v778_v24, %v1736_v32 }
  0xf0   : > { %1339 = vpush %v1113_v6  ;;  %v622_v33 = vadd.f32 1e-06, %v1859_v7  ;;  %v679_v6 = vsub.f32 %v1290_v48, %v1897_v53  ;;  %v720_v48 = vsub.f32 %v1294_v36, %v1948_v19  ;;  %v659_v8 = vrot.slane %v655_v43, %v1736_v32 }
  0xf1   : > { %1341 = vpush %v1120_v5  ;;  %v708_v5 = vrot.slane %v704_v44, %v1736_v32  ;;  %v790_v43 = vrot.slane %v786_v52, %v1736_v32 }
  0xf2   : > { %1408 = vrcp.f32 %v622_v33  ;;  %v712_v33 = vsub.f32 %v1293_v49, %v1897_v53  ;;  %v683_v40 = vrot.slane %v679_v6, %v1736_v32  ;;  %v753_v49 = vsub.f32 %v1297_v38, %v1948_v19 }
  0xf3   : > { %v1868_v12 = vpop.permute.xlu1 %862  ;;  %v1127_v13 = vpop.permute.xlu0 %1126  ;;  %v1993_v6 = vrot.slane %v811_v26, %v1736_v32  ;;  %v724_v38 = vrot.slane %v720_v48, %v1736_v32 }
  0xf4   : > { %1343 = vpush %v1127_v13  ;;  %v716_v41 = vrot.slane %v712_v33, %v1736_v32  ;;  %v1996_v33 = vrot.slane %v844_v35, %v1736_v32  ;;  %v757_v39 = vrot.slane %v753_v49, %v1736_v32 }
  0xf7   : > { %v1884_v25 = vpop.permute.xlu1 %934  ;;  %v1891_v34 = vpop.permute.xlu0 %1006 }
  0xfc   : > { %v1916_v59 = vpop.permute.xlu1 %939  ;;  %v1935_v13 = vpop.eup %1408 }
  0xfd   : > { %v1937_v15 = vpop.permute.xlu0 %867  ;;  %v632_v28 = vmul.f32 %v1935_v13, %v1837_v50  ;;  %v661_v30 = vmul.f32 %v1935_v13, %v1840_v55  ;;  %v1966_v31 = vmul.f32 %v1935_v13, %v1843_v58  ;;  %v687_v50 = vsub.f32 %v1291_v21, %v1948_v19 }
  0xfe   : > { %v1978_v58 = vmul.f32 %v1935_v13, %v1846_v61  ;;  %v942_v48 = vmul.f32 %v1871_v14, %v1916_v59  ;;  %v793_v52 = vmul.f32 %v1935_v13, %v1852_v2  ;;  %v937_v59 = vmul.f32 %v1884_v25, %v1866_v11 }
  0xff   : > { %v639_v44 = vmul.f32 %v638_v42, %v632_v28  ;;  %v668_v55 = vmul.f32 %v667_v45, %v661_v30  ;;  %v701_v45 = vmul.f32 %v700_v9, %v1966_v31  ;;  %v646_v0 = vmul.f32 %v645_v63, %v632_v28 }
 0x100   : > { %v1958_v27 = vpop.permute.xlu1 %1011  ;;  %v676_v61 = vmul.f32 %v675_v3, %v661_v30  ;;  %v734_v21 = vmul.f32 %v733_v51, %v1978_v58  ;;  %v760_v9 = vmul.f32 %v1935_v13, %v1849_v62  ;;  %v852_v63 = vsub.f32 %v1306_v54, %v1948_v19 }
 0x101   : > { %v1987_v57 = vpop.permute.xlu0 %1083  ;;  %v669_v42 = vadd.f32 %v668_v55, %v639_v44  ;;  %v709_v24 = vmul.f32 %v708_v5, %v1966_v31  ;;  %v653_v26 = vmul.f32 %v652_v23, %v632_v28  ;;  %v684_v36 = vmul.f32 %v683_v40, %v661_v30 }
 0x102   : > { %v677_v3 = vadd.f32 %v676_v61, %v646_v0  ;;  %v691_v35 = vrot.slane %v687_v50, %v1736_v32  ;;  %v717_v62 = vmul.f32 %v716_v41, %v1966_v31  ;;  %v742_v54 = vmul.f32 %v741_v16, %v1978_v58 }
 0x103   : > { %v702_v20 = vadd.f32 %v701_v45, %v669_v42  ;;  %v685_v55 = vadd.f32 %v684_v36, %v653_v26  ;;  %v660_v23 = vmul.f32 %v659_v8, %v632_v28  ;;  %v823_v40 = vrot.slane %v819_v18, %v1736_v32 }
 0x104   : > { %v710_v51 = vadd.f32 %v709_v24, %v677_v3  ;;  %v2015_v50 = vrot.slane %v852_v63, %v1736_v32  ;;  %v767_v49 = vmul.f32 %v1919_v60, %v760_v9  ;;  %v865_v16 = vmul.f32 %v1868_v12, %v1866_v11 }
 0x105   : > { %v1990_v1 = vpop.permute.xlu1 %1078  ;;  %v735_v44 = vadd.f32 %v734_v21, %v702_v20  ;;  %v2010_v47 = vpop.permute.xlu0 %1017  ;;  %s2022_s12 = spop %1313  ;;  %v718_v41 = vadd.f32 %v717_v62, %v685_v55  ;;  %v750_v42 = vmul.f32 %v749_v46, %v1978_v58  ;;  %v692_v45 = vmul.f32 %v691_v35, %v661_v30 }
 0x106   : > { %v743_v28 = vadd.f32 %v742_v54, %v710_v51  ;;  %v1009_v60 = vmul.f32 %v1891_v34, %v1866_v11  ;;  %v870_v2 = vmul.f32 %v1871_v14, %v1937_v15  ;;  %v775_v61 = vmul.f32 %v1941_v17, %v760_v9 }
 0x107   : > { %v768_v0 = vadd.f32 %v767_v49, %v735_v44  ;;  %v751_v8 = vadd.f32 %v750_v42, %v718_v41  ;;  %v693_v12 = vadd.f32 %v692_v45, %v660_v23  ;;  %v725_v18 = vmul.f32 %v724_v38, %v1966_v31 }
 0x108   : > { %v826_v25 = vmul.f32 %v1935_v13, %v1856_v4  ;;  %v943_v20 = vadd.f32 %v942_v48, %v937_v59  ;;  %v800_v34 = vmul.f32 %v1922_v56, %v793_v52  ;;  %v783_v21 = vmul.f32 %v782_v10, %v760_v9 }
 0x109   : > { %s2026_s14 = spop %1315  ;;  %v776_v15 = vadd.f32 %v775_v61, %v743_v28  ;;  %v726_v63 = vadd.f32 %v725_v18, %v693_v12  ;;  %v758_v17 = vmul.f32 %v757_v39, %v1978_v58  ;;  %v1014_v31 = vmul.f32 %v1871_v14, %v1958_v27 }
 0x10a   : > { %v874_v5 = vpop.permute.xlu1 %873  ;;  %s2036_s8 = spop %1317  ;;  %v952_v30 = vpop.permute.xlu0 %951  ;;  %v801_v24 = vadd.f32 %v800_v34, %v768_v0  ;;  %v808_v26 = vmul.f32 %v1944_v37, %v793_v52  ;;  %v784_v36 = vadd.f32 %v783_v21, %v751_v8  ;;  %v791_v10 = vmul.f32 %v790_v43, %v760_v9 }
 0x10b   : > { %v954_v4 = vmul.f32 %v1948_v19, %v952_v30  ;;  %v759_v56 = vadd.f32 %v758_v17, %v726_v63  ;;  %v2052_v44 = vmul.f32 %v1935_v13, %v1859_v7  ;;  %v833_v58 = vmul.f32 %v1925_v29, %v826_v25 }
 0x10c   : > { %v816_v39 = vmul.f32 %v1993_v6, %v793_v52  ;;  %v876_v27 = vmul.f32 %v1897_v53, %v874_v5  ;;  %v809_v51 = vadd.f32 %v808_v26, %v776_v15  ;;  %v871_v54 = vadd.f32 %v870_v2, %v865_v16 }
 0x10d   : > { %s2042_s13 = spop %1319  ;;  %v792_v37 = vadd.f32 %v791_v10, %v759_v56  ;;  %v1015_v23 = vadd.f32 %v1014_v31, %v1009_v60  ;;  %v1086_v9 = vmul.f32 %v1871_v14, %v1987_v57  ;;  %v2059_v43 = vadd.f32 %v833_v58, %v801_v24 }
 0x10e   : > { %v946_v46 = vpop.permute.xlu1 %945  ;;  %s1322_s15 = spop %1321  ;;  %v841_v7 = vmul.f32 %v1953_v22, %v826_v25  ;;  %v817_v13 = vadd.f32 %v816_v39, %v784_v36  ;;  %v824_v29 = vmul.f32 %v823_v40, %v793_v52  ;;  %v849_v5 = vmul.f32 %v1996_v33, %v826_v25 }
 0x10f   : > { %v948_v3 = vmul.f32 %v1897_v53, %v946_v46  ;;  %v964_v55 = vstv %s1322_s15  ;;  %v877_v48 = vadd.f32 %v876_v27, %v871_v54  ;;  %v1081_v40 = vmul.f32 %v1990_v1, %v1866_v11  ;;  %s1308_s15 = sshll.u32 %s1575_s25, 6  ;;  %s1518_s25 = smov [#allocation6]  }
 0x110   : > { %v966_v49 = vmul.f32 %v964_v55, %v2059_v43  ;;  %v2065_v28 = vadd.f32 %v841_v7, %v809_v51  ;;  %v825_v14 = vadd.f32 %v824_v29, %v792_v37  ;;  %v1020_v33 = vmul.f32 %v1897_v53, %v2010_v47 }
 0x111   : > { %v949_v35 = vadd.f32 %v948_v3, %v943_v20  ;;  %s1324_s17 = spop %1323  ;;  %v857_v52 = vmul.f32 %v2015_v50, %v826_v25  ;;  %v2074_v45 = vadd.f32 %v849_v5, %v817_v13  ;;  %v892_v0 = vstv %s2022_s12 }
 0x112   : > { %v1090_v38 = vpop.permute.xlu1 %1089  ;;  %s1326_s26 = spop %1325  ;;  %v971_v41 = vstv %s1324_s17  ;;  %v899_v61 = vstv %s2026_s14  ;;  %v1087_v46 = vadd.f32 %v1086_v9, %v1081_v40  ;;  %v1021_v30 = vadd.f32 %v1020_v33, %v1015_v23 }
 0x113   : > { %v955_v62 = vadd.f32 %v954_v4, %v949_v35  ;;  %v978_v42 = vstv %s1326_s26  ;;  %v973_v60 = vmul.f32 %v971_v41, %v2065_v28  ;;  %v1092_v8 = vmul.f32 %v1897_v53, %v1090_v38 }
 0x114   : > { %v2084_v47 = vadd.f32 %v857_v52, %v825_v14  ;;  %v980_v12 = vmul.f32 %v978_v42, %v2074_v45  ;;  %v906_v25 = vstv %s2036_s8  ;;  %v894_v20 = vmul.f32 %v892_v0, %v2059_v43  ;;  %s1257_s8 = sshll.u32 %s1659_s7, 2 }
 0x115   : > { %v959_v6 = vrot.slane %v955_v62, %v1736_v32  ;;  %s1328_s11 = spop %1327  ;;  %v901_v63 = vmul.f32 %v899_v61, %v2065_v28  ;;  %v913_v17 = vstv %s2042_s13  ;;  %v1093_v3 = vadd.f32 %v1092_v8, %v1087_v46  ;;  %s334_s13 = scalar_lea.vmem [#allocation6], %s1257_s8 }
 0x116   : > { %s2077_s16 = spop %1329  ;;  %v985_v11 = vstv %s1328_s11  ;;  %v908_v10 = vmul.f32 %v906_v25, %v2074_v45  ;;  %v915_v51 = vmul.f32 %v913_v17, %v2084_v47  ;;  %s1161_s17 = sshll.u32 %s334_s13, 4  ;;  %s2125_s17 = int_to_ptr.vmem [resolvable:$true] %s1161_s17 }
 0x117   : > { %v880_v16 = vpop.permute.xlu1 %879  ;;  %v960_v57 = vmul.f32 %v959_v6, %v2052_v44  ;;  %v987_v21 = vmul.f32 %v985_v11, %v2084_v47  ;;  %v1036_v4 = vstv %s2077_s16  ;;  %s2123_s16 = scalar_lea.hbm %s2173_s6, %s1308_s15 }
 0x118   : > { %v882_v22 = vmul.f32 %v1948_v19, %v880_v16  ;;  %v1038_v37 = vmul.f32 %v1036_v4, %v2059_v43 }
 0x119   : > { %v967_v59 = vadd.f32 %v966_v49, %v960_v57  ;;  %s2082_s19 = spop %1331 }
 0x11a   : > { %v883_v2 = vadd.f32 %v882_v22, %v877_v48  ;;  %s2089_s20 = spop %1333  ;;  %v1043_v39 = vstv %s2082_s19  ;;  %s1148_s19 = scalar_lea.sflag [#allocation4], %s1659_s7 }
 0x11b   : > { %v1024_v1 = vpop.permute.xlu1 %1023  ;;  %v974_v50 = vadd.f32 %v973_v60, %v967_v59  ;;  %v1050_v23 = vstv %s2089_s20  ;;  %v1045_v7 = vmul.f32 %v1043_v39, %v2065_v28  ;;  %s1438_s20 = scalar_lea.vmem %s2125_s17, 64 }
 0x11c   : > { %v887_v18 = vrot.slane %v883_v2, %v1736_v32  ;;  %v1026_v53 = vmul.f32 %v1948_v19, %v1024_v1  ;;  %v1052_v16 = vmul.f32 %v1050_v23, %v2074_v45  ;;  %p1439_p6 = scmp.ne.s32.totalorder %s2125_s17, %s1438_s20 }
 0x11d   : > { %v981_v34 = vadd.f32 %v980_v12, %v974_v50  ;;  %s2095_s28 = spop %1335 }
 0x11e   : > { %v888_v15 = vmul.f32 %v887_v18, %v2052_v44  ;;  %v1027_v31 = vadd.f32 %v1026_v53, %v1021_v30  ;;  %s1338_s18 = spop %1337  ;;  %v1057_v29 = vstv %s2095_s28  ;;  %v927_v53 = vpop.permute.xlu0 %926  ;;  %p1440_p0 = pnand %p1439_p6, %p2180_p11 }
 0x11f   : > { %v1096_v24 = vpop.permute.xlu1 %1095  ;;  %v988_v26 = vadd.f32 %v987_v21, %v981_v34  ;;  %v1108_v62 = vstv %s1338_s18  ;;  %v1059_v42 = vmul.f32 %v1057_v29, %v2084_v47  ;;  %s1442_s28 = sshll.u32 %s1518_s25, 4  ;;  %s1443_s28 = int_to_ptr.vmem [resolvable:$false] %s1442_s28 }
 0x120   : > { %v895_v36 = vadd.f32 %v894_v20, %v888_v15  ;;  %v1098_v56 = vmul.f32 %v1948_v19, %v1096_v24  ;;  %v1031_v35 = vrot.slane %v1027_v31, %v1736_v32  ;;  %v1110_v5 = vmul.f32 %v1108_v62, %v2059_v43  ;;  %p1441_p3 = pneg %p1440_p0  ;;  %s1444_s18 = scalar_lea.vmem %s1443_s28, 128 }
 0x121   : > { %v989_v38 = vrot.slane %v988_v26, 4  ;;  %s1340_s29 = spop %1339  ;;  %p1445_p4 = scmp.lt.s32.totalorder %s2125_s17, %s1443_s28 }
 0x122   : > { %v902_v58 = vadd.f32 %v901_v63, %v895_v36  ;;  %v1099_v27 = vadd.f32 %v1098_v56, %v1093_v3  ;;  %v1032_v55 = vmul.f32 %v1031_v35, %v2052_v44  ;;  %s1342_s12 = spop %1341  ;;  %v1115_v6 = vstv %s1340_s29  ;;  %v1143_v56 = vpop.permute.xlu0 %1142  ;;  %p1446_p7 = scmp.lt.s32.totalorder %s1444_s18, %s1438_s20 }
 0x123   : > { %v990_v54 = vmax.f32 %v988_v26, %v989_v38  ;;  %v1122_v57 = vstv %s1342_s12  ;;  %v1117_v22 = vmul.f32 %v1115_v6, %v2065_v28 }
 0x124   : > { %v1103_v19 = vrot.slane %v1099_v27, %v1736_v32  ;;  %v909_v9 = vadd.f32 %v908_v10, %v902_v58  ;;  %v1039_v13 = vadd.f32 %v1038_v37, %v1032_v55  ;;  %v999_v61 = vpop.permute.xlu1 %998  ;;  %p1447_p8 = por %p1446_p7, %p1445_p4 }
 0x125   : > { %s1344_s14 = spop %1343  ;;  %v991_v49 = vrot.slane %v990_v54, 2 }
 0x126   : > { %v1104_v48 = vmul.f32 %v1103_v19, %v2052_v44  ;;  %v916_v41 = vadd.f32 %v915_v51, %v909_v9  ;;  %v1046_v14 = vadd.f32 %v1045_v7, %v1039_v13  ;;  %v1129_v59 = vstv %s1344_s14  ;;  %p1448_p12 = pnand %p1447_p8, %p1441_p3 }
 0x127   : > { %v992_v40 = vmax.f32 %v990_v54, %v991_v49  ;;  %v1124_v44 = vmul.f32 %v1122_v57, %v2074_v45  ;;  %v1131_v11 = vmul.f32 %v1129_v59, %v2084_v47 }
 0x128   : > { %v1111_v32 = vadd.f32 %v1110_v5, %v1104_v48  ;;  %v917_v33 = vrot.slane %v916_v41, 4  ;;  %v1053_v52 = vadd.f32 %v1052_v16, %v1046_v14  ;;  %v1071_v3 = vpop.permute.xlu1 %1070 }
 0x129   : > { %v993_v60 = vrot.slane %v992_v40, 1 }
 0x12a   : > { %v1118_v43 = vadd.f32 %v1117_v22, %v1111_v32  ;;  %v918_v2 = vmax.f32 %v916_v41, %v917_v33  ;;  %v1060_v0 = vadd.f32 %v1059_v42, %v1053_v52 }
 0x12b   : > { %v994_v1 = vmax.f32 %v992_v40, %v993_v60 }
 0x12c   : > { %v1125_v8 = vadd.f32 %v1124_v44, %v1118_v43  ;;  %v919_v50 = vrot.slane %v918_v2, 2  ;;  %v1061_v28 = vrot.slane %v1060_v0, 4 }
 0x12d   : > { %v1001_v18 = vadd.f32 %v999_v61, %v994_v1 }
 0x12e   : > { %v1132_v12 = vadd.f32 %v1131_v11, %v1125_v8  ;;  %v920_v46 = vmax.f32 %v918_v2, %v919_v50  ;;  %v1062_v30 = vmax.f32 %v1060_v0, %v1061_v28 }
 0x12f   : > { %1002 = vst [vmem:[%s334_s13 + $0x1] sm:$0x1] %v1001_v18 }
 0x130   : > { %v1133_v25 = vrot.slane %v1132_v12, 4  ;;  %v921_v45 = vrot.slane %v920_v46, 1  ;;  %v1063_v20 = vrot.slane %v1062_v30, 2 }
 0x132   : > { %v1134_v34 = vmax.f32 %v1132_v12, %v1133_v25  ;;  %v922_v21 = vmax.f32 %v920_v46, %v921_v45  ;;  %v1064_v15 = vmax.f32 %v1062_v30, %v1063_v20 }
 0x134   : > { %v929_v63 = vadd.f32 %v927_v53, %v922_v21  ;;  %v1135_v17 = vrot.slane %v1134_v34, 2  ;;  %v1065_v47 = vrot.slane %v1064_v15, 1 }
 0x136   : > { %930 = vst [vmem:[%s334_s13] sm:$0x1] %v929_v63  ;;  %v1136_v31 = vmax.f32 %v1134_v34, %v1135_v17  ;;  %v1066_v24 = vmax.f32 %v1064_v15, %v1065_v47 }
 0x138   : > { %v1137_v26 = vrot.slane %v1136_v31, 1  ;;  %v1073_v4 = vadd.f32 %v1071_v3, %v1066_v24 }
 0x13a   : > { %v1138_v36 = vmax.f32 %v1136_v31, %v1137_v26  ;;  %1074 = vst [vmem:[%s334_s13 + $0x2] sm:$0x1] %v1073_v4 }
 0x13c   : > { %v1145_v10 = vadd.f32 %v1143_v56, %v1138_v36 }
 0x13e   : > { %1146 = vst [vmem:[%s334_s13 + $0x3] sm:$0x1] %v1145_v10 }
 0x13f   : > { %1451 = shalt.err (!%p1448_p12)
}
 0x140   : > { %s1452_s7 = scalar_lea.hbm %s2123_s16, 64  ;;  %s1456_s14 = scalar_lea.hbm %s2173_s6, 128 }
 0x141   : > { %p1453_p13 = scmp.ne.s32.totalorder %s2123_s16, %s1452_s7  ;;  %p1457_p5 = scmp.lt.u32.totalorder %s2123_s16, %s2173_s6 }
 0x142   : > { %p1458_p9 = scmp.lt.u32.totalorder %s1456_s14, %s1452_s7  ;;  %p1460_p6 = scmp.lt.u32.totalorder %s1452_s7, %s2123_s16 }
 0x143   : > { %p1454_p1 = pnand %p1453_p13, %p2180_p11 }
 0x144   : > { %p1459_p10 = por %p1458_p9, %p1457_p5 }
 0x145   : > { %p1455_p2 = pneg %p1454_p1 }
 0x146   : > { %p1461_p0 = por %p1460_p6, %p1459_p10 }
 0x148   : > { %p1462_p3 = pnand %p1461_p0, %p1455_p2 }
 0x14a   : > { %1465 = shalt.err (!%p1462_p3)
}
 0x14b   : > { %1347 = dma.vmem_to_hbm [thread:$0]  (%p2180_p11), %s2125_s17, 64, %s2123_s16, %s1148_s19  }
 0x14c PF: > { %s1173_s15 = sand.u32 1, %s1492_s21   ;;  %p2181_p4 = scmp.ne.s32.totalorder %s2179_s10, 0 }
 0x14d   : > { %p2182_p7 = scmp.ge.s32.totalorder %s1504_s24, 2  ;;  %s1174_s26 = scalar_lea.sflag [#allocation4], %s1173_s15 }
 0x14f   : > { %p1350_p8 = pnand %p2182_p7, %p2181_p4 }
 0x151   : > { %1487 = dma.done.wait (!%p1350_p8), %s1174_s26, 64  }
 0x152   : > { %1489 = vsyncadd (!%p1350_p8), %s1174_s26, 4294967232  ;;  %p19_p12 = scmp.ge.s32.totalorder %s1579_s27, 4   ;;  %s2183_s21 = smov %s1496_s22 }
 0x153   : > { %s2184_s22 = smov %s1500_s23  ;;  %s2185_s23 = smov %s1591_s30 }
 0x154   : > { %s2186_s24 = smov %s1579_s27  ;;  %21 = sbr.rel (!%p19_p12) target bundleno = 5 (0x5), region = 149 }
 0x15b   :  { %1179 = vsyncpa [#allocation3], 1 }
 0x15c   :  { %1181 = vsyncpa [#allocation3 + $0x1], 1 }
 0x15d   :  { %1182 = vsyncpa [#allocation4], 1 }
 0x15e   :  { %1184 = vsyncpa [#allocation4 + $0x1], 1 }

</bundles_post_ra>
